<compile_context>
chip_gen: v5e
topology: v5e:2x2
jax: 0.10.0
libtpu: 0.0.40
codegen_flags: <defaults>
</compile_context>

<pallas_src>
import functools
import math

import jax
import jax.numpy as jnp
from jax.experimental import pallas as pl
from jax.experimental.pallas import tpu as pltpu


# ---------------------------------------------------------------------------
# Kernel
# ---------------------------------------------------------------------------
def _side_to_fea_kernel(x_ref, m_ref, w0_ref, w1_ref, w2_ref, w3_ref, b_ref,
                        o_ref, *, shifts):
    """One grid step: a block of samples through 4x (conv3x3 + LeakyReLU).

    x_ref : VMEM (c0, L)            channels-major activations (source dtype)
    m_ref : VMEM (9, L)  f32        boundary masks (1 keep / 0 zero), t = kh*3+kw
    wK_ref: VMEM (nf, 9*c_prev) bf16 im2col weights, column = t*c_prev + c
    b_ref : VMEM (4, nf, 1) f32     per-layer biases
    o_ref : VMEM (nf, L)
    """
    f32 = jnp.float32
    bf16 = jnp.bfloat16

    masks = m_ref[...]                               # (9, L) f32, VMEM resident

    def conv3x3_lrelu(act, w_ref_l, bias):
        # act: (C, L) f32.  Build the im2col stack (9*C, L) with XLU lane
        # rolls + precomputed boundary masks, then ONE MXU matmul with bf16
        # operands and f32 accumulation.
        planes = []
        for t in range(9):
            shift = shifts[t]
            p = act if shift == 0 else pltpu.roll(act, shift, axis=1)
            if t != 4:                               # center tap needs no mask
                p = p * masks[t:t + 1, :]
            planes.append(p)
        # Concatenate in f32 (8-row aligned), single cast to bf16 for the MXU.
        stacked = jnp.concatenate(planes, axis=0).astype(bf16)   # (9*C, L)
        y = jnp.dot(w_ref_l[...], stacked,
                    preferred_element_type=f32)                  # (nf, L) f32
        y = y + bias
        return jnp.maximum(y, 0.1 * y)               # LeakyReLU(slope=0.1)

    act = x_ref[...].astype(f32)                     # cast inside the kernel
    act = conv3x3_lrelu(act, w0_ref, b_ref[0])
    act = conv3x3_lrelu(act, w1_ref, b_ref[1])
    act = conv3x3_lrelu(act, w2_ref, b_ref[2])
    act = conv3x3_lrelu(act, w3_ref, b_ref[3])
    o_ref[...] = act.astype(o_ref.dtype)


# ---------------------------------------------------------------------------
# Wrapper helpers
# ---------------------------------------------------------------------------
def _im2col_weight(w, c_pad):
    """(C_out, C_in, 3, 3) -> (C_out, 9*c_pad) bf16, column = (kh*3+kw)*c_pad + c."""
    c_out, c_in, kh, kw = w.shape
    w = jnp.transpose(w, (0, 2, 3, 1))               # (C_out, 3, 3, C_in)
    if c_pad > c_in:
        w = jnp.pad(w, ((0, 0), (0, 0), (0, 0), (0, c_pad - c_in)))
    return w.reshape(c_out, kh * kw * c_pad).astype(jnp.bfloat16)


def _boundary_masks(H, W, bb):
    """(9, bb*H*W) f32: 1.0 where the tap's source pixel lies inside the image."""
    HW = H * W
    pos = jnp.arange(HW, dtype=jnp.int32)
    row, col = pos // W, pos % W
    rows = []
    for dy in (-1, 0, 1):
        for dx in (-1, 0, 1):
            valid = ((row + dy >= 0) & (row + dy < H) &
                     (col + dx >= 0) & (col + dx < W))
            rows.append(valid.astype(jnp.float32))
    return jnp.tile(jnp.stack(rows), (1, bb))


def _vmem_capacity_bytes():
    try:
        cap = getattr(pltpu.get_tpu_info(), "vmem_capacity_bytes", None)
        if cap:
            return int(cap)
    except Exception:
        pass
    return 64 * 1024 * 1024                          # conservative (v7x-sized)


def _pick_samples_per_block(N, HW, bytes_per_lane, budget_bytes):
    """Largest divisor of N whose block fits the VMEM budget, preferring >= 2
    grid steps (pipelining / megacore) and (bb*HW) % 128 == 0."""
    m0 = 128 // math.gcd(HW, 128)                    # lane-alignment granule
    cands = [b for b in range(m0, N + 1, m0) if N % b == 0]
    if not cands:
        return N                                     # full-dim block is legal
    max_lanes = max(budget_bytes // bytes_per_lane, HW)
    fitting = [b for b in cands if b * HW <= max_lanes] or [cands[0]]
    multi = [b for b in fitting if N // b >= 2]
    return max(multi) if multi else max(fitting)


# ---------------------------------------------------------------------------
# Public wrapper
# ---------------------------------------------------------------------------
def side_to_fea(side, params, *, samples_per_block=None):
    """Pallas TPU forward of side_to_fea.  params = [(w0,b0),...,(w3,b3)] (OIHW)."""
    N, C_in, H, W = side.shape
    (w0, b0), (w1, b1), (w2, b2), (w3, b3) = params
    nf = w0.shape[0]
    assert w0.shape == (nf, C_in, 3, 3)
    for w in (w1, w2, w3):
        assert w.shape == (nf, nf, 3, 3)
    assert nf % 8 == 0

    HW = H * W
    c0 = ((C_in + 7) // 8) * 8                       # pad input channels to sublanes
    in_isz = side.dtype.itemsize
    out_dtype = side.dtype
    out_isz = jnp.dtype(out_dtype).itemsize

    # Per-lane VMEM footprint of one grid step (double-buffered in/out blocks,
    # resident masks, f32 act + f32 im2col stack + bf16 stack + f32 result).
    bytes_per_lane = (2 * c0 * in_isz + 2 * nf * out_isz + 2 * 9 * 4
                      + nf * (4 + 36 + 18 + 4))

    vmem_cap = _vmem_capacity_bytes()
    vmem_limit = min(vmem_cap * 3 // 4, 96 * 1024 * 1024)   # ~48 MiB v7x, 96 MiB v5e/v6e
    budget = vmem_limit // 2                                 # leave pipelining headroom

    if samples_per_block is None:
        bb = _pick_samples_per_block(N, HW, bytes_per_lane, budget)
    else:
        bb = samples_per_block
    if N % bb != 0 or ((bb * HW) % 128 != 0 and bb != N):
        bb = N                                       # full-dim block fallback
    n_blocks = N // bb
    L = bb * HW

    # Channels-major lane-dense layout (c0, N*HW) in the SOURCE dtype.
    # NOTE: this transpose (and its inverse on the output) is a real HBM copy.
    x_in = jnp.transpose(side, (1, 0, 2, 3)).reshape(C_in, N * HW)
    if c0 > C_in:
        x_in = jnp.pad(x_in, ((0, c0 - C_in), (0, 0)))

    w0t = _im2col_weight(w0, c0)                     # (nf, 9*c0)  bf16
    w1t = _im2col_weight(w1, nf)                     # (nf, 9*nf)  bf16
    w2t = _im2col_weight(w2, nf)
    w3t = _im2col_weight(w3, nf)
    b_all = jnp.stack([b0, b1, b2, b3]).astype(jnp.float32).reshape(4, nf, 1)
    masks = _boundary_masks(H, W, bb)                # (9, L) f32

    # Static lane shifts (jnp.roll convention): shifted[p] == act[p + dy*W + dx].
    shifts = tuple((-(dy * W + dx)) % L for dy in (-1, 0, 1) for dx in (-1, 0, 1))

    kernel = functools.partial(_side_to_fea_kernel, shifts=shifts)
    resident2 = lambda n: (0, 0)                     # weights/masks stay VMEM resident
    resident3 = lambda n: (0, 0, 0)

    flops = 2 * N * HW * nf * 9 * (C_in + 3 * nf)
    bytes_accessed = (x_in.size * in_isz + nf * N * HW * out_isz
                      + 2 * (w0t.size + w1t.size + w2t.size + w3t.size)
                      + 4 * (b_all.size + masks.size))

    out = pl.pallas_call(
        kernel,
        out_shape=jax.ShapeDtypeStruct((nf, N * HW), out_dtype),
        grid_spec=pltpu.PrefetchScalarGridSpec(
            num_scalar_prefetch=0,
            grid=(n_blocks,),
            in_specs=[
                pl.BlockSpec((c0, L), lambda n: (0, n)),
                pl.BlockSpec((9, L), resident2),
                pl.BlockSpec((nf, 9 * c0), resident2),
                pl.BlockSpec((nf, 9 * nf), resident2),
                pl.BlockSpec((nf, 9 * nf), resident2),
                pl.BlockSpec((nf, 9 * nf), resident2),
                pl.BlockSpec((4, nf, 1), resident3),
            ],
            out_specs=pl.BlockSpec((nf, L), lambda n: (0, n)),
        ),
        compiler_params=pltpu.CompilerParams(
            dimension_semantics=("parallel",),
            vmem_limit_bytes=int(vmem_limit),
        ),
        cost_estimate=pl.CostEstimate(
            flops=int(flops), transcendentals=0,
            bytes_accessed=int(bytes_accessed)),
    )(x_in, masks, w0t, w1t, w2t, w3t, b_all)

    # back to NCHW  (real HBM copy; consume channels-major upstream if possible)
    return jnp.transpose(out.reshape(nf, N, H, W), (1, 0, 2, 3))


# ---------------------------------------------------------------------------
# Reference + self-test
# ---------------------------------------------------------------------------
def _reference(side, params, *, operand_dtype=jnp.float32):
    """Pure-JAX reference of the PyTorch forward; operand_dtype=bf16 emulates
    the kernel's bf16-operand / f32-accumulation MXU numerics."""
    x = side.astype(jnp.float32)
    for w, b in params:
        x = jax.lax.conv_general_dilated(
            x.astype(operand_dtype), w.astype(operand_dtype),
            window_strides=(1, 1), padding=((1, 1), (1, 1)),
            dimension_numbers=("NCHW", "OIHW", "NCHW"),
            preferred_element_type=jnp.float32,
            precision=jax.lax.Precision.HIGHEST)
        x = x + b[None, :, None, None].astype(jnp.float32)
        x = jnp.where(x >= 0, x, 0.1 * x)            # LeakyReLU(0.1)
    return x


if __name__ == "__main__":
    key = jax.random.PRNGKey(0)
    keys = jax.random.split(key, 9)

    N, C_in, H, W = 2, 3, 16, 16
    nf = 32

    side = jax.random.normal(keys[0], (N, C_in, H, W), jnp.float32)

    # deterministic kaiming-like init for the 4 conv layers (with bias)
    params = []
    cin = C_in
    for l in range(4):
        fan_in = cin * 9
        w = jax.random.normal(keys[1 + 2 * l], (nf, cin, 3, 3),
                              jnp.float32) * (2.0 / fan_in) ** 0.5
        b = 0.01 * jax.random.normal(keys[2 + 2 * l], (nf,), jnp.float32)
        params.append((w, b))
        cin = nf

    out = jax.block_until_ready(side_to_fea(side, params))
    assert out.shape == (N, nf, H, W)

    # Tight check vs a reference with matched bf16-operand / f32-acc numerics.
    ref_bf16 = _reference(side, params, operand_dtype=jnp.bfloat16)
    err_m = float(jnp.max(jnp.abs(out - ref_bf16)))
    assert jnp.allclose(out, ref_bf16, atol=5e-3, rtol=5e-3), (
        f"matched-precision mismatch, max abs err = {err_m}")

    # Loose sanity check vs the full-f32 reference (kernel uses bf16 MXU operands).
    ref_f32 = _reference(side, params, operand_dtype=jnp.float32)
    err_f = float(jnp.max(jnp.abs(out - ref_f32)))
    assert jnp.allclose(out, ref_f32, atol=5e-2, rtol=5e-2), (
        f"f32-reference mismatch, max abs err = {err_f}")

    print("KERNEL_OK")
</pallas_src>

<mosaic_0001>
module attributes {stable_mosaic.version = 11 : i64} {
  func.func @_side_to_fea_kernel(%arg0: i32, %arg1: memref<8x256xf32, #tpu.memory_space<vmem>>, %arg2: memref<9x256xf32, #tpu.memory_space<vmem>>, %arg3: memref<32x72xbf16, #tpu.memory_space<vmem>>, %arg4: memref<32x288xbf16, #tpu.memory_space<vmem>>, %arg5: memref<32x288xbf16, #tpu.memory_space<vmem>>, %arg6: memref<32x288xbf16, #tpu.memory_space<vmem>>, %arg7: memref<4x32x1xf32, #tpu.memory_space<vmem>>, %arg8: memref<32x256xf32, #tpu.memory_space<vmem>>) attributes {dimension_semantics = [#tpu.dimension_semantics<parallel>], iteration_bounds = array<i64: 2>, scalar_prefetch = 0 : i64, scratch_operands = 0 : i64, tpu.core_type = #tpu.core_type<tc>, window_params = [{transform_indices = @transform_0, window_bounds = array<i64: 8, 256>}, {pipeline_mode = #tpu.pipeline_mode<synchronous>, transform_indices = @transform_1, window_bounds = array<i64: 9, 256>}, {pipeline_mode = #tpu.pipeline_mode<synchronous>, transform_indices = @transform_2, window_bounds = array<i64: 32, 72>}, {pipeline_mode = #tpu.pipeline_mode<synchronous>, transform_indices = @transform_3, window_bounds = array<i64: 32, 288>}, {pipeline_mode = #tpu.pipeline_mode<synchronous>, transform_indices = @transform_4, window_bounds = array<i64: 32, 288>}, {pipeline_mode = #tpu.pipeline_mode<synchronous>, transform_indices = @transform_5, window_bounds = array<i64: 32, 288>}, {pipeline_mode = #tpu.pipeline_mode<synchronous>, transform_indices = @transform_6, window_bounds = array<i64: 4, 32, 1>}, {transform_indices = @transform_7, window_bounds = array<i64: 32, 256>}]} {
    %c0 = arith.constant 0 : index
    %c0_0 = arith.constant 0 : index
    %0 = vector.load %arg2[%c0, %c0_0] : memref<9x256xf32, #tpu.memory_space<vmem>>, vector<9x256xf32>
    %c0_1 = arith.constant 0 : index
    %c0_2 = arith.constant 0 : index
    %1 = vector.load %arg1[%c0_1, %c0_2] : memref<8x256xf32, #tpu.memory_space<vmem>>, vector<8x256xf32>
    %c0_3 = arith.constant 0 : index
    %c0_4 = arith.constant 0 : index
    %c0_5 = arith.constant 0 : index
    %2 = vector.load %arg7[%c0_3, %c0_4, %c0_5] : memref<4x32x1xf32, #tpu.memory_space<vmem>>, vector<1x32x1xf32>
    %3 = vector.shape_cast %2 : vector<1x32x1xf32> to vector<32x1xf32>
    %c17_i32 = arith.constant 17 : i32
    %4 = tpu.dynamic_rotate %1 by %c17_i32 dim 1 : vector<8x256xf32>, i32 -> vector<8x256xf32>
    %5 = vector.extract_strided_slice %0 {offsets = [0, 0], sizes = [1, 256], strides = [1, 1]} : vector<9x256xf32> to vector<1x256xf32>
    %6 = vector.broadcast %5 : vector<1x256xf32> to vector<8x256xf32>
    %7 = arith.mulf %4, %6 : vector<8x256xf32>
    %c16_i32 = arith.constant 16 : i32
    %8 = tpu.dynamic_rotate %1 by %c16_i32 dim 1 : vector<8x256xf32>, i32 -> vector<8x256xf32>
    %9 = vector.extract_strided_slice %0 {offsets = [1, 0], sizes = [1, 256], strides = [1, 1]} : vector<9x256xf32> to vector<1x256xf32>
    %10 = vector.broadcast %9 : vector<1x256xf32> to vector<8x256xf32>
    %11 = arith.mulf %8, %10 : vector<8x256xf32>
    %c15_i32 = arith.constant 15 : i32
    %12 = tpu.dynamic_rotate %1 by %c15_i32 dim 1 : vector<8x256xf32>, i32 -> vector<8x256xf32>
    %13 = vector.extract_strided_slice %0 {offsets = [2, 0], sizes = [1, 256], strides = [1, 1]} : vector<9x256xf32> to vector<1x256xf32>
    %14 = vector.broadcast %13 : vector<1x256xf32> to vector<8x256xf32>
    %15 = arith.mulf %12, %14 : vector<8x256xf32>
    %c1_i32 = arith.constant 1 : i32
    %16 = tpu.dynamic_rotate %1 by %c1_i32 dim 1 : vector<8x256xf32>, i32 -> vector<8x256xf32>
    %17 = vector.extract_strided_slice %0 {offsets = [3, 0], sizes = [1, 256], strides = [1, 1]} : vector<9x256xf32> to vector<1x256xf32>
    %18 = vector.broadcast %17 : vector<1x256xf32> to vector<8x256xf32>
    %19 = arith.mulf %16, %18 : vector<8x256xf32>
    %c255_i32 = arith.constant 255 : i32
    %20 = tpu.dynamic_rotate %1 by %c255_i32 dim 1 : vector<8x256xf32>, i32 -> vector<8x256xf32>
    %21 = vector.extract_strided_slice %0 {offsets = [5, 0], sizes = [1, 256], strides = [1, 1]} : vector<9x256xf32> to vector<1x256xf32>
    %22 = vector.broadcast %21 : vector<1x256xf32> to vector<8x256xf32>
    %23 = arith.mulf %20, %22 : vector<8x256xf32>
    %c241_i32 = arith.constant 241 : i32
    %24 = tpu.dynamic_rotate %1 by %c241_i32 dim 1 : vector<8x256xf32>, i32 -> vector<8x256xf32>
    %25 = vector.extract_strided_slice %0 {offsets = [6, 0], sizes = [1, 256], strides = [1, 1]} : vector<9x256xf32> to vector<1x256xf32>
    %26 = vector.broadcast %25 : vector<1x256xf32> to vector<8x256xf32>
    %27 = arith.mulf %24, %26 : vector<8x256xf32>
    %c240_i32 = arith.constant 240 : i32
    %28 = tpu.dynamic_rotate %1 by %c240_i32 dim 1 : vector<8x256xf32>, i32 -> vector<8x256xf32>
    %29 = vector.extract_strided_slice %0 {offsets = [7, 0], sizes = [1, 256], strides = [1, 1]} : vector<9x256xf32> to vector<1x256xf32>
    %30 = vector.broadcast %29 : vector<1x256xf32> to vector<8x256xf32>
    %31 = arith.mulf %28, %30 : vector<8x256xf32>
    %c239_i32 = arith.constant 239 : i32
    %32 = tpu.dynamic_rotate %1 by %c239_i32 dim 1 : vector<8x256xf32>, i32 -> vector<8x256xf32>
    %33 = vector.extract_strided_slice %0 {offsets = [8, 0], sizes = [1, 256], strides = [1, 1]} : vector<9x256xf32> to vector<1x256xf32>
    %34 = vector.broadcast %33 : vector<1x256xf32> to vector<8x256xf32>
    %35 = arith.mulf %32, %34 : vector<8x256xf32>
    %36 = tpu.concatenate %7, %11, %15, %19, %1, %23, %27, %31, %35 in 0 : vector<8x256xf32>, vector<8x256xf32>, vector<8x256xf32>, vector<8x256xf32>, vector<8x256xf32>, vector<8x256xf32>, vector<8x256xf32>, vector<8x256xf32>, vector<8x256xf32> -> vector<72x256xf32>
    %37 = arith.truncf %36 : vector<72x256xf32> to vector<72x256xbf16>
    %c0_6 = arith.constant 0 : index
    %c0_7 = arith.constant 0 : index
    %38 = vector.load %arg3[%c0_6, %c0_7] : memref<32x72xbf16, #tpu.memory_space<vmem>>, vector<32x72xbf16>
    %cst = arith.constant dense<0.000000e+00> : vector<32x256xf32>
    %39 = tpu.matmul %38, %37, %cst {dimension_numbers = #tpu.dot_dimension_numbers<[1], [0], [0], [1], [0, 0, 1, 1], [], []>} : vector<32x72xbf16>, vector<72x256xbf16>, vector<32x256xf32> -> vector<32x256xf32>
    %40 = vector.broadcast %3 : vector<32x1xf32> to vector<32x256xf32>
    %41 = arith.addf %39, %40 : vector<32x256xf32>
    %cst_8 = arith.constant 1.000000e-01 : f32
    %42 = vector.broadcast %cst_8 : f32 to vector<32x256xf32>
    %43 = arith.mulf %42, %41 : vector<32x256xf32>
    %44 = arith.maximumf %41, %43 : vector<32x256xf32>
    %c1 = arith.constant 1 : index
    %c0_9 = arith.constant 0 : index
    %c0_10 = arith.constant 0 : index
    %45 = vector.load %arg7[%c1, %c0_9, %c0_10] : memref<4x32x1xf32, #tpu.memory_space<vmem>>, vector<1x32x1xf32>
    %46 = vector.shape_cast %45 : vector<1x32x1xf32> to vector<32x1xf32>
    %c17_i32_11 = arith.constant 17 : i32
    %47 = tpu.dynamic_rotate %44 by %c17_i32_11 dim 1 : vector<32x256xf32>, i32 -> vector<32x256xf32>
    %48 = vector.extract_strided_slice %0 {offsets = [0, 0], sizes = [1, 256], strides = [1, 1]} : vector<9x256xf32> to vector<1x256xf32>
    %49 = vector.broadcast %48 : vector<1x256xf32> to vector<32x256xf32>
    %50 = arith.mulf %47, %49 : vector<32x256xf32>
    %c16_i32_12 = arith.constant 16 : i32
    %51 = tpu.dynamic_rotate %44 by %c16_i32_12 dim 1 : vector<32x256xf32>, i32 -> vector<32x256xf32>
    %52 = vector.extract_strided_slice %0 {offsets = [1, 0], sizes = [1, 256], strides = [1, 1]} : vector<9x256xf32> to vector<1x256xf32>
    %53 = vector.broadcast %52 : vector<1x256xf32> to vector<32x256xf32>
    %54 = arith.mulf %51, %53 : vector<32x256xf32>
    %c15_i32_13 = arith.constant 15 : i32
    %55 = tpu.dynamic_rotate %44 by %c15_i32_13 dim 1 : vector<32x256xf32>, i32 -> vector<32x256xf32>
    %56 = vector.extract_strided_slice %0 {offsets = [2, 0], sizes = [1, 256], strides = [1, 1]} : vector<9x256xf32> to vector<1x256xf32>
    %57 = vector.broadcast %56 : vector<1x256xf32> to vector<32x256xf32>
    %58 = arith.mulf %55, %57 : vector<32x256xf32>
    %c1_i32_14 = arith.constant 1 : i32
    %59 = tpu.dynamic_rotate %44 by %c1_i32_14 dim 1 : vector<32x256xf32>, i32 -> vector<32x256xf32>
    %60 = vector.extract_strided_slice %0 {offsets = [3, 0], sizes = [1, 256], strides = [1, 1]} : vector<9x256xf32> to vector<1x256xf32>
    %61 = vector.broadcast %60 : vector<1x256xf32> to vector<32x256xf32>
    %62 = arith.mulf %59, %61 : vector<32x256xf32>
    %c255_i32_15 = arith.constant 255 : i32
    %63 = tpu.dynamic_rotate %44 by %c255_i32_15 dim 1 : vector<32x256xf32>, i32 -> vector<32x256xf32>
    %64 = vector.extract_strided_slice %0 {offsets = [5, 0], sizes = [1, 256], strides = [1, 1]} : vector<9x256xf32> to vector<1x256xf32>
    %65 = vector.broadcast %64 : vector<1x256xf32> to vector<32x256xf32>
    %66 = arith.mulf %63, %65 : vector<32x256xf32>
    %c241_i32_16 = arith.constant 241 : i32
    %67 = tpu.dynamic_rotate %44 by %c241_i32_16 dim 1 : vector<32x256xf32>, i32 -> vector<32x256xf32>
    %68 = vector.extract_strided_slice %0 {offsets = [6, 0], sizes = [1, 256], strides = [1, 1]} : vector<9x256xf32> to vector<1x256xf32>
    %69 = vector.broadcast %68 : vector<1x256xf32> to vector<32x256xf32>
    %70 = arith.mulf %67, %69 : vector<32x256xf32>
    %c240_i32_17 = arith.constant 240 : i32
    %71 = tpu.dynamic_rotate %44 by %c240_i32_17 dim 1 : vector<32x256xf32>, i32 -> vector<32x256xf32>
    %72 = vector.extract_strided_slice %0 {offsets = [7, 0], sizes = [1, 256], strides = [1, 1]} : vector<9x256xf32> to vector<1x256xf32>
    %73 = vector.broadcast %72 : vector<1x256xf32> to vector<32x256xf32>
    %74 = arith.mulf %71, %73 : vector<32x256xf32>
    %c239_i32_18 = arith.constant 239 : i32
    %75 = tpu.dynamic_rotate %44 by %c239_i32_18 dim 1 : vector<32x256xf32>, i32 -> vector<32x256xf32>
    %76 = vector.extract_strided_slice %0 {offsets = [8, 0], sizes = [1, 256], strides = [1, 1]} : vector<9x256xf32> to vector<1x256xf32>
    %77 = vector.broadcast %76 : vector<1x256xf32> to vector<32x256xf32>
    %78 = arith.mulf %75, %77 : vector<32x256xf32>
    %79 = tpu.concatenate %50, %54, %58, %62, %44, %66, %70, %74, %78 in 0 : vector<32x256xf32>, vector<32x256xf32>, vector<32x256xf32>, vector<32x256xf32>, vector<32x256xf32>, vector<32x256xf32>, vector<32x256xf32>, vector<32x256xf32>, vector<32x256xf32> -> vector<288x256xf32>
    %80 = arith.truncf %79 : vector<288x256xf32> to vector<288x256xbf16>
    %c0_19 = arith.constant 0 : index
    %c0_20 = arith.constant 0 : index
    %81 = vector.load %arg4[%c0_19, %c0_20] : memref<32x288xbf16, #tpu.memory_space<vmem>>, vector<32x288xbf16>
    %cst_21 = arith.constant dense<0.000000e+00> : vector<32x256xf32>
    %82 = tpu.matmul %81, %80, %cst_21 {dimension_numbers = #tpu.dot_dimension_numbers<[1], [0], [0], [1], [0, 0, 1, 1], [], []>} : vector<32x288xbf16>, vector<288x256xbf16>, vector<32x256xf32> -> vector<32x256xf32>
    %83 = vector.broadcast %46 : vector<32x1xf32> to vector<32x256xf32>
    %84 = arith.addf %82, %83 : vector<32x256xf32>
    %cst_22 = arith.constant 1.000000e-01 : f32
    %85 = vector.broadcast %cst_22 : f32 to vector<32x256xf32>
    %86 = arith.mulf %85, %84 : vector<32x256xf32>
    %87 = arith.maximumf %84, %86 : vector<32x256xf32>
    %c2 = arith.constant 2 : index
    %c0_23 = arith.constant 0 : index
    %c0_24 = arith.constant 0 : index
    %88 = vector.load %arg7[%c2, %c0_23, %c0_24] : memref<4x32x1xf32, #tpu.memory_space<vmem>>, vector<1x32x1xf32>
    %89 = vector.shape_cast %88 : vector<1x32x1xf32> to vector<32x1xf32>
    %c17_i32_25 = arith.constant 17 : i32
    %90 = tpu.dynamic_rotate %87 by %c17_i32_25 dim 1 : vector<32x256xf32>, i32 -> vector<32x256xf32>
    %91 = vector.extract_strided_slice %0 {offsets = [0, 0], sizes = [1, 256], strides = [1, 1]} : vector<9x256xf32> to vector<1x256xf32>
    %92 = vector.broadcast %91 : vector<1x256xf32> to vector<32x256xf32>
    %93 = arith.mulf %90, %92 : vector<32x256xf32>
    %c16_i32_26 = arith.constant 16 : i32
    %94 = tpu.dynamic_rotate %87 by %c16_i32_26 dim 1 : vector<32x256xf32>, i32 -> vector<32x256xf32>
    %95 = vector.extract_strided_slice %0 {offsets = [1, 0], sizes = [1, 256], strides = [1, 1]} : vector<9x256xf32> to vector<1x256xf32>
    %96 = vector.broadcast %95 : vector<1x256xf32> to vector<32x256xf32>
    %97 = arith.mulf %94, %96 : vector<32x256xf32>
    %c15_i32_27 = arith.constant 15 : i32
    %98 = tpu.dynamic_rotate %87 by %c15_i32_27 dim 1 : vector<32x256xf32>, i32 -> vector<32x256xf32>
    %99 = vector.extract_strided_slice %0 {offsets = [2, 0], sizes = [1, 256], strides = [1, 1]} : vector<9x256xf32> to vector<1x256xf32>
    %100 = vector.broadcast %99 : vector<1x256xf32> to vector<32x256xf32>
    %101 = arith.mulf %98, %100 : vector<32x256xf32>
    %c1_i32_28 = arith.constant 1 : i32
    %102 = tpu.dynamic_rotate %87 by %c1_i32_28 dim 1 : vector<32x256xf32>, i32 -> vector<32x256xf32>
    %103 = vector.extract_strided_slice %0 {offsets = [3, 0], sizes = [1, 256], strides = [1, 1]} : vector<9x256xf32> to vector<1x256xf32>
    %104 = vector.broadcast %103 : vector<1x256xf32> to vector<32x256xf32>
    %105 = arith.mulf %102, %104 : vector<32x256xf32>
    %c255_i32_29 = arith.constant 255 : i32
    %106 = tpu.dynamic_rotate %87 by %c255_i32_29 dim 1 : vector<32x256xf32>, i32 -> vector<32x256xf32>
    %107 = vector.extract_strided_slice %0 {offsets = [5, 0], sizes = [1, 256], strides = [1, 1]} : vector<9x256xf32> to vector<1x256xf32>
    %108 = vector.broadcast %107 : vector<1x256xf32> to vector<32x256xf32>
    %109 = arith.mulf %106, %108 : vector<32x256xf32>
    %c241_i32_30 = arith.constant 241 : i32
    %110 = tpu.dynamic_rotate %87 by %c241_i32_30 dim 1 : vector<32x256xf32>, i32 -> vector<32x256xf32>
    %111 = vector.extract_strided_slice %0 {offsets = [6, 0], sizes = [1, 256], strides = [1, 1]} : vector<9x256xf32> to vector<1x256xf32>
    %112 = vector.broadcast %111 : vector<1x256xf32> to vector<32x256xf32>
    %113 = arith.mulf %110, %112 : vector<32x256xf32>
    %c240_i32_31 = arith.constant 240 : i32
    %114 = tpu.dynamic_rotate %87 by %c240_i32_31 dim 1 : vector<32x256xf32>, i32 -> vector<32x256xf32>
    %115 = vector.extract_strided_slice %0 {offsets = [7, 0], sizes = [1, 256], strides = [1, 1]} : vector<9x256xf32> to vector<1x256xf32>
    %116 = vector.broadcast %115 : vector<1x256xf32> to vector<32x256xf32>
    %117 = arith.mulf %114, %116 : vector<32x256xf32>
    %c239_i32_32 = arith.constant 239 : i32
    %118 = tpu.dynamic_rotate %87 by %c239_i32_32 dim 1 : vector<32x256xf32>, i32 -> vector<32x256xf32>
    %119 = vector.extract_strided_slice %0 {offsets = [8, 0], sizes = [1, 256], strides = [1, 1]} : vector<9x256xf32> to vector<1x256xf32>
    %120 = vector.broadcast %119 : vector<1x256xf32> to vector<32x256xf32>
    %121 = arith.mulf %118, %120 : vector<32x256xf32>
    %122 = tpu.concatenate %93, %97, %101, %105, %87, %109, %113, %117, %121 in 0 : vector<32x256xf32>, vector<32x256xf32>, vector<32x256xf32>, vector<32x256xf32>, vector<32x256xf32>, vector<32x256xf32>, vector<32x256xf32>, vector<32x256xf32>, vector<32x256xf32> -> vector<288x256xf32>
    %123 = arith.truncf %122 : vector<288x256xf32> to vector<288x256xbf16>
    %c0_33 = arith.constant 0 : index
    %c0_34 = arith.constant 0 : index
    %124 = vector.load %arg5[%c0_33, %c0_34] : memref<32x288xbf16, #tpu.memory_space<vmem>>, vector<32x288xbf16>
    %cst_35 = arith.constant dense<0.000000e+00> : vector<32x256xf32>
    %125 = tpu.matmul %124, %123, %cst_35 {dimension_numbers = #tpu.dot_dimension_numbers<[1], [0], [0], [1], [0, 0, 1, 1], [], []>} : vector<32x288xbf16>, vector<288x256xbf16>, vector<32x256xf32> -> vector<32x256xf32>
    %126 = vector.broadcast %89 : vector<32x1xf32> to vector<32x256xf32>
    %127 = arith.addf %125, %126 : vector<32x256xf32>
    %cst_36 = arith.constant 1.000000e-01 : f32
    %128 = vector.broadcast %cst_36 : f32 to vector<32x256xf32>
    %129 = arith.mulf %128, %127 : vector<32x256xf32>
    %130 = arith.maximumf %127, %129 : vector<32x256xf32>
    %c3 = arith.constant 3 : index
    %c0_37 = arith.constant 0 : index
    %c0_38 = arith.constant 0 : index
    %131 = vector.load %arg7[%c3, %c0_37, %c0_38] : memref<4x32x1xf32, #tpu.memory_space<vmem>>, vector<1x32x1xf32>
    %132 = vector.shape_cast %131 : vector<1x32x1xf32> to vector<32x1xf32>
    %c17_i32_39 = arith.constant 17 : i32
    %133 = tpu.dynamic_rotate %130 by %c17_i32_39 dim 1 : vector<32x256xf32>, i32 -> vector<32x256xf32>
    %134 = vector.extract_strided_slice %0 {offsets = [0, 0], sizes = [1, 256], strides = [1, 1]} : vector<9x256xf32> to vector<1x256xf32>
    %135 = vector.broadcast %134 : vector<1x256xf32> to vector<32x256xf32>
    %136 = arith.mulf %133, %135 : vector<32x256xf32>
    %c16_i32_40 = arith.constant 16 : i32
    %137 = tpu.dynamic_rotate %130 by %c16_i32_40 dim 1 : vector<32x256xf32>, i32 -> vector<32x256xf32>
    %138 = vector.extract_strided_slice %0 {offsets = [1, 0], sizes = [1, 256], strides = [1, 1]} : vector<9x256xf32> to vector<1x256xf32>
    %139 = vector.broadcast %138 : vector<1x256xf32> to vector<32x256xf32>
    %140 = arith.mulf %137, %139 : vector<32x256xf32>
    %c15_i32_41 = arith.constant 15 : i32
    %141 = tpu.dynamic_rotate %130 by %c15_i32_41 dim 1 : vector<32x256xf32>, i32 -> vector<32x256xf32>
    %142 = vector.extract_strided_slice %0 {offsets = [2, 0], sizes = [1, 256], strides = [1, 1]} : vector<9x256xf32> to vector<1x256xf32>
    %143 = vector.broadcast %142 : vector<1x256xf32> to vector<32x256xf32>
    %144 = arith.mulf %141, %143 : vector<32x256xf32>
    %c1_i32_42 = arith.constant 1 : i32
    %145 = tpu.dynamic_rotate %130 by %c1_i32_42 dim 1 : vector<32x256xf32>, i32 -> vector<32x256xf32>
    %146 = vector.extract_strided_slice %0 {offsets = [3, 0], sizes = [1, 256], strides = [1, 1]} : vector<9x256xf32> to vector<1x256xf32>
    %147 = vector.broadcast %146 : vector<1x256xf32> to vector<32x256xf32>
    %148 = arith.mulf %145, %147 : vector<32x256xf32>
    %c255_i32_43 = arith.constant 255 : i32
    %149 = tpu.dynamic_rotate %130 by %c255_i32_43 dim 1 : vector<32x256xf32>, i32 -> vector<32x256xf32>
    %150 = vector.extract_strided_slice %0 {offsets = [5, 0], sizes = [1, 256], strides = [1, 1]} : vector<9x256xf32> to vector<1x256xf32>
    %151 = vector.broadcast %150 : vector<1x256xf32> to vector<32x256xf32>
    %152 = arith.mulf %149, %151 : vector<32x256xf32>
    %c241_i32_44 = arith.constant 241 : i32
    %153 = tpu.dynamic_rotate %130 by %c241_i32_44 dim 1 : vector<32x256xf32>, i32 -> vector<32x256xf32>
    %154 = vector.extract_strided_slice %0 {offsets = [6, 0], sizes = [1, 256], strides = [1, 1]} : vector<9x256xf32> to vector<1x256xf32>
    %155 = vector.broadcast %154 : vector<1x256xf32> to vector<32x256xf32>
    %156 = arith.mulf %153, %155 : vector<32x256xf32>
    %c240_i32_45 = arith.constant 240 : i32
    %157 = tpu.dynamic_rotate %130 by %c240_i32_45 dim 1 : vector<32x256xf32>, i32 -> vector<32x256xf32>
    %158 = vector.extract_strided_slice %0 {offsets = [7, 0], sizes = [1, 256], strides = [1, 1]} : vector<9x256xf32> to vector<1x256xf32>
    %159 = vector.broadcast %158 : vector<1x256xf32> to vector<32x256xf32>
    %160 = arith.mulf %157, %159 : vector<32x256xf32>
    %c239_i32_46 = arith.constant 239 : i32
    %161 = tpu.dynamic_rotate %130 by %c239_i32_46 dim 1 : vector<32x256xf32>, i32 -> vector<32x256xf32>
    %162 = vector.extract_strided_slice %0 {offsets = [8, 0], sizes = [1, 256], strides = [1, 1]} : vector<9x256xf32> to vector<1x256xf32>
    %163 = vector.broadcast %162 : vector<1x256xf32> to vector<32x256xf32>
    %164 = arith.mulf %161, %163 : vector<32x256xf32>
    %165 = tpu.concatenate %136, %140, %144, %148, %130, %152, %156, %160, %164 in 0 : vector<32x256xf32>, vector<32x256xf32>, vector<32x256xf32>, vector<32x256xf32>, vector<32x256xf32>, vector<32x256xf32>, vector<32x256xf32>, vector<32x256xf32>, vector<32x256xf32> -> vector<288x256xf32>
    %166 = arith.truncf %165 : vector<288x256xf32> to vector<288x256xbf16>
    %c0_47 = arith.constant 0 : index
    %c0_48 = arith.constant 0 : index
    %167 = vector.load %arg6[%c0_47, %c0_48] : memref<32x288xbf16, #tpu.memory_space<vmem>>, vector<32x288xbf16>
    %cst_49 = arith.constant dense<0.000000e+00> : vector<32x256xf32>
    %168 = tpu.matmul %167, %166, %cst_49 {dimension_numbers = #tpu.dot_dimension_numbers<[1], [0], [0], [1], [0, 0, 1, 1], [], []>} : vector<32x288xbf16>, vector<288x256xbf16>, vector<32x256xf32> -> vector<32x256xf32>
    %169 = vector.broadcast %132 : vector<32x1xf32> to vector<32x256xf32>
    %170 = arith.addf %168, %169 : vector<32x256xf32>
    %cst_50 = arith.constant 1.000000e-01 : f32
    %171 = vector.broadcast %cst_50 : f32 to vector<32x256xf32>
    %172 = arith.mulf %171, %170 : vector<32x256xf32>
    %173 = arith.maximumf %170, %172 : vector<32x256xf32>
    %c0_51 = arith.constant 0 : index
    %c0_52 = arith.constant 0 : index
    %174 = vector.load %arg8[%c0_51, %c0_52] : memref<32x256xf32, #tpu.memory_space<vmem>>, vector<32x256xf32>
    tpu.vector_store %arg8[%c0_51, %c0_52], %173 {strides = array<i32>} : memref<32x256xf32, #tpu.memory_space<vmem>>, vector<32x256xf32>,
    return
  }
  func.func @transform_0(%arg0: i32) -> (i32, i32) {
    %c0_i32 = arith.constant 0 : i32
    %c0_i32_0 = arith.constant 0 : i32
    return %c0_i32, %arg0 : i32, i32
  }
  func.func @transform_1(%arg0: i32) -> (i32, i32) {
    %c0_i32 = arith.constant 0 : i32
    %c0_i32_0 = arith.constant 0 : i32
    %c0_i32_1 = arith.constant 0 : i32
    return %c0_i32, %c0_i32_0 : i32, i32
  }
  func.func @transform_2(%arg0: i32) -> (i32, i32) {
    %c0_i32 = arith.constant 0 : i32
    %c0_i32_0 = arith.constant 0 : i32
    %c0_i32_1 = arith.constant 0 : i32
    return %c0_i32, %c0_i32_0 : i32, i32
  }
  func.func @transform_3(%arg0: i32) -> (i32, i32) {
    %c0_i32 = arith.constant 0 : i32
    %c0_i32_0 = arith.constant 0 : i32
    %c0_i32_1 = arith.constant 0 : i32
    return %c0_i32, %c0_i32_0 : i32, i32
  }
  func.func @transform_4(%arg0: i32) -> (i32, i32) {
    %c0_i32 = arith.constant 0 : i32
    %c0_i32_0 = arith.constant 0 : i32
    %c0_i32_1 = arith.constant 0 : i32
    return %c0_i32, %c0_i32_0 : i32, i32
  }
  func.func @transform_5(%arg0: i32) -> (i32, i32) {
    %c0_i32 = arith.constant 0 : i32
    %c0_i32_0 = arith.constant 0 : i32
    %c0_i32_1 = arith.constant 0 : i32
    return %c0_i32, %c0_i32_0 : i32, i32
  }
  func.func @transform_6(%arg0: i32) -> (i32, i32, i32) {
    %c0_i32 = arith.constant 0 : i32
    %c0_i32_0 = arith.constant 0 : i32
    %c0_i32_1 = arith.constant 0 : i32
    %c0_i32_2 = arith.constant 0 : i32
    return %c0_i32, %c0_i32_0, %c0_i32_1 : i32, i32, i32
  }
  func.func @transform_7(%arg0: i32) -> (i32, i32) {
    %c0_i32 = arith.constant 0 : i32
    %c0_i32_0 = arith.constant 0 : i32
    return %c0_i32, %arg0 : i32, i32
  }
}

</mosaic_0001>

<bundles_post_ra>
// kernel: tpu_custom_call.1
= control target key start
LH: loop header
LB: loop body
LE: loop exit
PB: predicated region body
PF: predicated region fallthrough
CT: control target
= control target key end

     0   :  { %s4602_s0 = inlined_call_operand.vmem [shape: f32[8,512], index: 0, kind: input, shape index: {}]   ;;  %s4603_s1 = inlined_call_operand.hbm [shape: f32[9,256], index: 1, kind: input, shape index: {}]   ;;  %s4604_s2 = inlined_call_operand.hbm [shape: bf16[32,72], index: 2, kind: input, shape index: {}]   ;;  %s4605_s3 = inlined_call_operand.vmem [shape: bf16[32,288], index: 3, kind: input, shape index: {}]   ;;  %s4606_s4 = inlined_call_operand.vmem [shape: bf16[32,288], index: 4, kind: input, shape index: {}]   ;;  %s4607_s5 = inlined_call_operand.hbm [shape: bf16[32,288], index: 5, kind: input, shape index: {}]   ;;  %s4608_s6 = inlined_call_operand.vmem [shape: f32[4,32,1], index: 6, kind: input, shape index: {}]   ;;  %s4609_s7 = inlined_call_operand.hbm [shape: f32[32,512], index: 7, kind: output, shape index: {}]  }
   0x1   :  { %4669 = sst [smem:[#allocation34_spill]] %s4603_s1 }
   0x2   :  { %4670 = sst [smem:[#allocation35_spill]] %s4604_s2 }
   0x3   :  { %12 = vsyncpa [#allocation3], 0 }
   0x4   :  { %13 = vsyncpa [#allocation6], 0 }
   0x5   :  { %14 = vsyncpa [#allocation4], 0 }
   0x6   :  { %16 = vsyncpa [#allocation4 + $0x1], 0  ;;  %s2597_s24 = smov 0   ;;  %s2599_s25 = smov 0  }
   0x7   :  { %s2601_s26 = smov 0   ;;  %s2603_s27 = smov 0  }
   0x8 LB: > { %4671 = sst [smem:[#allocation12_spill]] %s2531_s26  ;;  %s2618_s28 = sadd.s32 4294967295, %s2535_s27   ;;  %s2535_s27 = sphi %s2603_s27, %s4789_s27   ;;  %s2531_s26 = sphi %s2601_s26, %s4786_s26   ;;  %s2527_s25 = sphi %s2599_s25, %s4788_s25   ;;  %s2523_s24 = sphi %s2597_s24, %s4787_s24  }
   0x9   : > { %s2134_s29 = sadd.s32 4294967294, %s2535_s27   ;;  %s2622_s30 = sadd.s32 1, %s2535_s27  }
   0xa   : > { %s181_s8 = sadd.s32 1, %s2531_s26  ;;  %s178_s9 = ssub.s32 %s2535_s27, %s2622_s30 }
   0xb   : > { %p191_p0 = scmp.ne.s32.totalorder %s2531_s26, %s2527_s25  ;;  %p179_p1 = scmp.eq.s32.totalorder %s178_s9, 0 }
   0xc   : > { %p192_p2 = scmp.eq.s32.totalorder %s2618_s28, 1  ;;  %p197_p3 = scmp.ne.s32.totalorder %s2527_s25, %s2523_s24 }
   0xd   : > { %p198_p4 = scmp.eq.s32.totalorder %s2134_s29, 1  ;;  %p2135_p7 = scmp.ge.s32.totalorder %s2535_s27, 1 }
   0xe   : > { %s2633_s10 = scalar_select %p179_p1, %s2531_s26, %s181_s8  }
   0xf   : > { %p2635_p5 = por %p192_p2, %p191_p0  ;;  %p2639_p6 = por %p198_p4, %p197_p3 }
  0x10   : > { %4672 = sst [smem:[#allocation13_spill]] %s2633_s10  ;;  %p205_p8 = scmp.lt.s32.totalorder %s2535_s27, 3 }
  0x11   : > { %p2309_p9 = scmp.eq.s32.totalorder %s2618_s28, 0  ;;  %s4676_s2 = sld [smem:[#allocation35_spill]] }
  0x12   : > { %p2646_p10 = pnand %p2135_p7, %p205_p8  ;;  %s2537_s17 = smov [#allocation5]  }
  0x13   : > { %s232_s18 = sshll.u32 %s2537_s17, 4  ;;  %s4678_s1 = sld [smem:[#allocation34_spill]]  ;;  %s233_s18 = int_to_ptr.vmem [resolvable:$true] %s232_s18 }
  0x14   : > { %p2295_p11 = pneg %p2646_p10  ;;  %s2538_s23 = smov 64  }
  0x15   : > { %s2539_s29 = smov 4   ;;  %s2540_s8 = smov [#allocation2]  }
  0x16   : > { %p2657_p12 = pnand %p2309_p9, %p2295_p11  ;;  %s218_s9 = sshll.u32 %s2540_s8, 4  ;;  %s219_s9 = int_to_ptr.vmem [resolvable:$true] %s218_s9 }
  0x17   : > { %s230_s16 = sshll.u32 %s4676_s2, 4  ;;  %s2541_s14 = smov 256   ;;  %s231_s16 = int_to_ptr.hbm [resolvable:$true] %s230_s16 }
  0x18   : > { %2301 = dma.hbm_to_vmem [thread:$0]  (!%p2657_p12), %s231_s16, 256, %s233_s18, [#allocation6], %s2538_s23, %s2538_s23, %s2539_s29  }
  0x19   : > { %s216_s22 = sshll.u32 %s4678_s1, 4  ;;  %s2542_s15 = smov 16   ;;  %s217_s22 = int_to_ptr.hbm [resolvable:$true] %s216_s22 }
  0x1a   : > { %2298 = dma.hbm_to_vmem [thread:$0]  (!%p2657_p12), %s217_s22, 512, %s219_s9, [#allocation3], %s2541_s14, %s2541_s14, %s2542_s15  }
  0x1b   : > { %s250_s20 = sshll.u32 %s4607_s5, 4  ;;  %s2543_s21 = smov [#allocation7]   ;;  %s251_s20 = int_to_ptr.hbm [resolvable:$true] %s250_s20 }
  0x1c   : > { %s252_s1 = sshll.u32 %s2543_s21, 4  ;;  %s2544_s10 = smov 192   ;;  %s253_s1 = int_to_ptr.vmem [resolvable:$true] %s252_s1 }
  0x1d   : > { %s2545_s26 = smov 12   ;;  %280 = sbr.rel (%p2646_p10) target bundleno = 1643 (0x66b), region = 48 }
  0x1e   : > { %2304 = dma.hbm_to_vmem [thread:$0]  (!%p2657_p12), %s251_s20, 768, %s253_s1, [#allocation6], %s2544_s10, %s2544_s10, %s2545_s26  }
  0x22   : > { %2510 = dma.done.wait (%p2309_p9), [#allocation3], 512  }
  0x23   : > { %2512 = vsyncadd (%p2309_p9), [#allocation3], 4294966784 }
  0x24   : > { %2514 = dma.done.wait (%p2309_p9), [#allocation6], 1024  }
  0x25   : > { %2516 = vsyncadd (%p2309_p9), [#allocation6], 4294966272  ;;  %s2145_s2 = sshll.u32 %s2618_s28, 1  ;;  %s2546_s16 = smov 113   ;;  %v345_v3 = vlaneseq  ;;  %v2726_v8 = vld [vmem:[#allocation2] sm:$0xff]  ;;  %v2728_v9 = vld [vmem:[#allocation2 + $0x8] sm:$0xff] }
  0x26   : > { %p324_p13 = scmp.lt.s32.totalorder %s2145_s2, 3  ;;  %s2547_s18 = smov 111   ;;  %v2732_v10 = vld [vmem:[#allocation2 + $0x10] ss:$0 sm:$0xff]  ;;  %v2734_v11 = vld [vmem:[#allocation2 + $0x18] ss:$0 sm:$0xff] }
  0x27   : > { %s2548_s19 = smov 112   ;;  %s2549_s22 = smov 127   ;;  %v2723_v6 = vand.u32 127, %v345_v3  ;;  %4679 = vst [vmem:[#allocation14_spill] sm:$0xff] %v2732_v10  ;;  %v2737_v14 = vperm.slane %v2726_v8, 6  ;;  %v2740_v15 = vperm.slane %v2726_v8, 7 }
  0x28   : > { %s4791_s2 = smov (!%p324_p13, %s2145_s2), 3  ;;  %s2550_s23 = smov 15   ;;  %4680 = vst [vmem:[#allocation15_spill] sm:$0xff] %v2734_v11  ;;  %v2743_v16 = vperm.slane %v2728_v9, 6  ;;  %v2746_v17 = vperm.slane %v2728_v9, 7  ;;  %vm482_vm3 = vcmask 1043456  }
  0x29   : > { %s2146_s1 = sshll.u32 %s4791_s2, 3  ;;  %s2551_s29 = smov 1   ;;  %vm413_vm0 = vcmp.lt.s32.totalorder %v2723_v6, 112  ;;  %vm402_vm1 = vcmp.lt.s32.totalorder %v2723_v6, 113  ;;  %vm424_vm2 = vcmp.lt.s32.totalorder %v2723_v6, 111  ;;  %4681 = vst [vmem:[#allocation16_spill] sm:$0xff] %v2740_v15 }
  0x2a   : > { %s327_s13 = scalar_lea.vmem %s4602_s0, %s2146_s1  ;;  %s2552_s8 = smov 17   ;;  %4682 = vst [vmem:[#allocation17_spill] sm:$0xff] %v2743_v16  ;;  %vm391_vm4 = vcmp.lt.s32.totalorder %v2723_v6, 127  ;;  %v2768_v35 = vperm.slane %v2726_v8, 5  ;;  %v2771_v36 = vperm.slane %v2728_v9, 5  ;;  %v339_v43 = vld [vmem:[%s4608_s6 + $0x10] sm:$0xff] }
  0x2b   : > { %v2687_v0 = vld [vmem:[%s327_s13] sm:$0xff]  ;;  %v2695_v1 = vld [vmem:[%s327_s13 + $0x8] sm:$0xff]  ;;  %s2553_s9 = smov 16   ;;  %4683 = vst [vmem:[#allocation18_spill] sm:$0xff] %v2746_v17  ;;  %v2554_v47 = vmov 0   ;;  %vm380_vm5 = vcmp.lt.s32.totalorder %v2723_v6, 1 }
  0x2c   : > { %398 = vrot.lane.b32.xlu1 %v2687_v0, %s2546_s16  ;;  %420 = vrot.lane.b32.xlu0 %v2687_v0, %s2547_s18  ;;  %4684 = vst [vmem:[#allocation19_spill] sm:$0xff] %v2771_v36  ;;  %v337_v44 = vld [vmem:[%s4608_s6] sm:$0xff]  ;;  %vm369_vm6 = vcmp.lt.s32.totalorder %v2723_v6, 15  ;;  %v2790_v51 = vperm.slane %v2726_v8, 2  ;;  %v2793_v52 = vperm.slane %v2726_v8, 3  ;;  %v2796_v53 = vperm.slane %v2728_v9, 2 }
  0x2d   : > { %409 = vrot.lane.b32.xlu2 %v2687_v0, %s2548_s19  ;;  %2370 = vset.pattern.permute.xlu0 %v2554_v47  ;;  %v2799_v54 = vperm.slane %v2728_v9, 3  ;;  %vm347_vm7 = vcmp.lt.s32.totalorder %v2723_v6, 17  ;;  %vm358_vm8 = vcmp.lt.s32.totalorder %v2723_v6, 16  ;;  %vm475_vm9 = vcmask 588800   ;;  %s2280_s1 = sshll.u32 %s2618_s28, 4 }
  0x2e   : > { %2368 = vset.pattern.permute.xlu1 %v2554_v47  ;;  %2369 = vset.pattern.permute.xlu2 %v2554_v47  ;;  %vm898_vm10 = vcmask 261120   ;;  %s2037_s13 = scalar_lea.hbm %s4609_s7, %s2280_s1 }
  0x2f   : > { %4685 = vst [vmem:[#allocation20_spill] sm:$0xff] %v2799_v54  ;;  %s2040_s15 = sshll.u32 %s2037_s13, 4  ;;  %s2041_s15 = int_to_ptr.hbm [resolvable:$true] %s2040_s15 }
  0x34   : > { %400 = vrot.lane.b32.xlu1 %v2695_v1, %s2546_s16  ;;  %422 = vrot.lane.b32.xlu0 %v2695_v1, %s2547_s18 }
  0x35   : > { %411 = vrot.lane.b32.xlu2 %v2695_v1, %s2548_s19 }
  0x3c   : > { %389 = vrot.lane.b32.xlu1 %v2695_v1, %s2549_s22  ;;  %387 = vrot.lane.b32.xlu0 %v2687_v0, %s2549_s22 }
  0x3d   : > { %365 = vrot.lane.b32.xlu2 %v2687_v0, %s2550_s23 }
  0x44   : > { %376 = vrot.lane.b32.xlu1 %v2687_v0, %s2551_s29  ;;  %367 = vrot.lane.b32.xlu0 %v2695_v1, %s2550_s23 }
  0x45   : > { %378 = vrot.lane.b32.xlu2 %v2695_v1, %s2551_s29 }
  0x4c   : > { %343 = vrot.lane.b32.xlu1 %v2695_v1, %s2552_s8  ;;  %341 = vrot.lane.b32.xlu0 %v2687_v0, %s2552_s8 }
  0x4d   : > { %354 = vrot.lane.b32.xlu2 %v2687_v0, %s2553_s9 }
  0x54   : > { %356 = vrot.lane.b32.xlu0 %v2695_v1, %s2553_s9  ;;  %457 = vperm.xlu1 %2368, %v339_v43  }
  0x5c   : > { %447 = vperm.xlu0 %2370, %v337_v44  }
  0x87   : > { %v410_v2 = vpop.permute.xlu2 %409 }
  0x8f   : > { %v412_v7 = vpop.permute.xlu2 %411 }
  0x90   : > { %v414_v18 = vsel %vm413_vm0, %v410_v2, %v412_v7  ;;  %v415_v22 = vsel %vm413_vm0, %v412_v7, %v410_v2 }
  0x91   : > { %v418_v30 = vmul.f32 %v2740_v15, %v414_v18  ;;  %v419_v32 = vmul.f32 %v2746_v17, %v415_v22  ;;  %v2825_v18 = vperm.slane %v2726_v8, 1 }
  0x97   : > { %v366_v28 = vpop.permute.xlu2 %365 }
  0x9e   : > { %v399_v4 = vpop.permute.xlu1 %398  ;;  %v421_v5 = vpop.permute.xlu0 %420 }
  0x9f   : > { %v379_v50 = vpop.permute.xlu2 %378 }
  0xa6   : > { %v401_v12 = vpop.permute.xlu1 %400  ;;  %v423_v13 = vpop.permute.xlu0 %422 }
  0xa7   : > { %v403_v19 = vsel %vm402_vm1, %v399_v4, %v401_v12  ;;  %v425_v20 = vsel %vm424_vm2, %v421_v5, %v423_v13  ;;  %v426_v21 = vsel %vm424_vm2, %v423_v13, %v421_v5  ;;  %v404_v23 = vsel %vm402_vm1, %v401_v12, %v399_v4  ;;  %v338_v4 = vld [vmem:[%s4608_s6 + $0x8] sm:$0xff]  ;;  %v340_v5 = vld [vmem:[%s4608_s6 + $0x18] sm:$0xff]  ;;  %v355_v13 = vpop.permute.xlu2 %354 }
  0xa8   : > { %v429_v24 = vmul.f32 %v2732_v10, %v425_v20  ;;  %v430_v25 = vmul.f32 %v2734_v11, %v426_v21  ;;  %v407_v29 = vmul.f32 %v2737_v14, %v403_v19  ;;  %v408_v31 = vmul.f32 %v2743_v16, %v404_v23  ;;  %452 = vperm.xlu1 %2368, %v338_v4  }
  0xa9   : > { %462 = vperm.xlu2 %2369, %v340_v5   ;;  %v2821_v12 = vperm.slane %v2726_v8, 0  ;;  %v2828_v19 = vperm.slane %v2728_v9, 0  ;;  %v2831_v20 = vperm.slane %v2728_v9, 1 }
  0xaa   : > { %v439_v26 = vpack.c.bf16 %v429_v24, %v429_v24  ;;  %v440_v27 = vpack.c.bf16 %v430_v25, %v430_v25  ;;  %v437_v39 = vpack.c.bf16 %v418_v30, %v407_v29  ;;  %v438_v42 = vpack.c.bf16 %v419_v32, %v408_v31  ;;  %v2260_v30 = vld [vmem:[#allocation5] sm:$0xff]  ;;  %v2261_v31 = vld [vmem:[#allocation5 + $0x8] sm:$0xff] }
  0xac   : > { %v484_v33 = vsel %vm482_vm3, %v439_v26, 0  ;;  %v487_v34 = vsel %vm482_vm3, %v440_v27, 0 }
  0xad   : > { %492 = vmatpush.bf16.msra.mxu0 %v484_v33  ;;  %511 = vmatpush.bf16.msra.mxu1 %v487_v34 }
  0xae   : > { %v390_v37 = vpop.permute.xlu1 %389  ;;  %v388_v38 = vpop.permute.xlu0 %387 }
  0xaf   : > { %v392_v40 = vsel %vm391_vm4, %v388_v38, %v390_v37  ;;  %v393_v41 = vsel %vm391_vm4, %v390_v37, %v388_v38 }
  0xb0   : > { %v396_v45 = vmul.f32 %v2768_v35, %v392_v40  ;;  %v397_v46 = vmul.f32 %v2771_v36, %v393_v41 }
  0xb1   : > { %493 = vmatpush.bf16.msra.mxu0 %v437_v39  ;;  %512 = vmatpush.bf16.msra.mxu1 %v438_v42 }
  0xb2   : > { %v435_v48 = vpack.c.bf16 %v396_v45, %v2687_v0  ;;  %v436_v49 = vpack.c.bf16 %v397_v46, %v2695_v1 }
  0xb5   : > { %494 = vmatpush.bf16.msra.mxu0 %v435_v48  ;;  %513 = vmatpush.bf16.msra.mxu1 %v436_v49 }
  0xb6   : > { %v377_v55 = vpop.permute.xlu1 %376  ;;  %v368_v56 = vpop.permute.xlu0 %367 }
  0xb7   : > { %v381_v57 = vsel %vm380_vm5, %v377_v55, %v379_v50  ;;  %v382_v58 = vsel %vm380_vm5, %v379_v50, %v377_v55  ;;  %v370_v59 = vsel %vm369_vm6, %v366_v28, %v368_v56  ;;  %v371_v60 = vsel %vm369_vm6, %v368_v56, %v366_v28 }
  0xb8   : > { %v374_v61 = vmul.f32 %v2790_v51, %v371_v60  ;;  %v385_v62 = vmul.f32 %v2793_v52, %v382_v58  ;;  %v375_v63 = vmul.f32 %v2796_v53, %v370_v59  ;;  %v386_v0 = vmul.f32 %v2799_v54, %v381_v57 }
  0xba   : > { %v433_v1 = vpack.c.bf16 %v385_v62, %v374_v61  ;;  %v434_v2 = vpack.c.bf16 %v386_v0, %v375_v63 }
  0xbc   : > { %495 = vmatpush.bf16.msra.mxu0 %v433_v1  ;;  %514 = vmatpush.bf16.msra.mxu1 %v434_v2 }
  0xbe   : > { %v342_v3 = vpop.permute.xlu0 %341  ;;  %v344_v7 = vpop.permute.xlu1 %343 }
  0xbf   : > { %v348_v21 = vsel %vm347_vm7, %v342_v3, %v344_v7  ;;  %v349_v22 = vsel %vm347_vm7, %v344_v7, %v342_v3 }
  0xc0   : > { %v352_v25 = vmul.f32 %v2821_v12, %v349_v22  ;;  %v353_v9 = vmul.f32 %v2828_v19, %v348_v21 }
  0xc6   : > { %v357_v23 = vpop.permute.xlu0 %356  ;;  %v458_v43 = vpop.permute.xlu1 %457 }
  0xc7   : > { %v359_v24 = vsel %vm358_vm8, %v355_v13, %v357_v23  ;;  %v360_v8 = vsel %vm358_vm8, %v357_v23, %v355_v13 }
  0xc8   : > { %v363_v26 = vmul.f32 %v2825_v18, %v360_v8  ;;  %v364_v27 = vmul.f32 %v2831_v20, %v359_v24 }
  0xca   : > { %v431_v28 = vpack.c.bf16 %v363_v26, %v352_v25  ;;  %v432_v29 = vpack.c.bf16 %v364_v27, %v353_v9 }
  0xcc   : > { %496 = vmatpush.bf16.msra.mxu0 %v431_v28  ;;  %515 = vmatpush.bf16.msra.mxu1 %v432_v29 }
  0xce   : > { %v448_v32 = vpop.permute.xlu0 %447 }
  0xcf   : > { %2155 = vmatmul.msk.bf16.vlgmr.msra.gmra.mxu0 %vm475_vm9, %v2260_v30  ;;  %2157 = vmatmul.msk.bf16.vlgmr.msra.gmra.mxu1 %vm475_vm9, %v2260_v30 }
  0xdf   : > { %2156 = vmatmul.msk.bf16.gmra.mxu0 %vm475_vm9, %v2261_v31  ;;  %2158 = vmatmul.msk.bf16.gmra.mxu1 %vm475_vm9, %v2261_v31 }
 0x103   : > { %v463_v1 = vpop.permute.xlu2 %462 }
 0x11a   : > { %v453_v44 = vpop.permute.xlu1 %452 }
 0x14c   : > { %v498_v33 = vpop.f32.mrf.mxu0  ;;  %v517_v34 = vpop.f32.mrf.mxu1 }
 0x14d   : > { %v499_v37 = vadd.f32 %v498_v33, %v448_v32  ;;  %v518_v38 = vadd.f32 %v517_v34, %v448_v32 }
 0x14f   : > { %v527_v39 = vmul.f32 0.1, %v499_v37  ;;  %v528_v40 = vmul.f32 0.1, %v518_v38 }
 0x151   : > { %v2845_v41 = vmax.f32 %v499_v37, %v527_v39  ;;  %v2847_v42 = vmax.f32 %v518_v38, %v528_v40 }
 0x153   : > { %4686 = vst [vmem:[#allocation21_spill] sm:$0xff] %v2845_v41  ;;  %652 = vrot.lane.b32.xlu1 %v2847_v42, %s2551_s29  ;;  %740 = vrot.lane.b32.xlu0 %v2845_v41, %s2548_s19 }
 0x154   : > { %4687 = vst [vmem:[#allocation22_spill] sm:$0xff] %v2847_v42  ;;  %644 = vrot.lane.b32.xlu2 %v2845_v41, %s2551_s29  ;;  %v500_v45 = vpop.f32.mrf.mxu0  ;;  %v519_v46 = vpop.f32.mrf.mxu1 }
 0x155   : > { %v501_v47 = vadd.f32 %v500_v45, %v453_v44  ;;  %v520_v48 = vadd.f32 %v519_v46, %v453_v44 }
 0x157   : > { %v529_v49 = vmul.f32 0.1, %v501_v47  ;;  %v530_v50 = vmul.f32 0.1, %v520_v48 }
 0x159   : > { %v2873_v55 = vmax.f32 %v501_v47, %v529_v49  ;;  %v2875_v56 = vmax.f32 %v520_v48, %v530_v50  ;;  %v2161_v49 = vld [vmem:[%s4608_s6 + $0x30] sm:$0xff]  ;;  %v2159_v50 = vld [vmem:[%s4608_s6 + $0x20] sm:$0xff] }
 0x15b   : > { %708 = vrot.lane.b32.xlu1 %v2845_v41, %s2546_s16  ;;  %612 = vrot.lane.b32.xlu0 %v2845_v41, %s2550_s23  ;;  %4688 = vst [vmem:[#allocation23_spill] sm:$0xff] %v2873_v55 }
 0x15c   : > { %748 = vrot.lane.b32.xlu2 %v2847_v42, %s2548_s19  ;;  %4689 = vst [vmem:[#allocation24_spill] sm:$0xff] %v2875_v56  ;;  %v503_v57 = vpop.f32.mrf.mxu0  ;;  %v522_v58 = vpop.f32.mrf.mxu1 }
 0x15d   : > { %v504_v59 = vadd.f32 %v503_v57, %v458_v43  ;;  %v523_v60 = vadd.f32 %v522_v58, %v458_v43 }
 0x15f   : > { %v531_v61 = vmul.f32 0.1, %v504_v59  ;;  %v532_v62 = vmul.f32 0.1, %v523_v60 }
 0x161   : > { %v2901_v63 = vmax.f32 %v504_v59, %v531_v61  ;;  %v2903_v0 = vmax.f32 %v523_v60, %v532_v62  ;;  %v2160_v60 = vld [vmem:[%s4608_s6 + $0x28] sm:$0xff]  ;;  %v2162_v61 = vld [vmem:[%s4608_s6 + $0x38] sm:$0xff] }
 0x163   : > { %580 = vrot.lane.b32.xlu1 %v2845_v41, %s2553_s9  ;;  %716 = vrot.lane.b32.xlu0 %v2847_v42, %s2546_s16  ;;  %4690 = vst [vmem:[#allocation25_spill] sm:$0xff] %v2901_v63 }
 0x164   : > { %620 = vrot.lane.b32.xlu2 %v2847_v42, %s2550_s23  ;;  %4691 = vst [vmem:[#allocation26_spill] sm:$0xff] %v2903_v0  ;;  %v505_v2 = vpop.f32.mrf.mxu0  ;;  %v524_v3 = vpop.f32.mrf.mxu1 }
 0x165   : > { %v506_v4 = vadd.f32 %v505_v2, %v463_v1  ;;  %v525_v5 = vadd.f32 %v524_v3, %v463_v1 }
 0x167   : > { %v533_v7 = vmul.f32 0.1, %v506_v4  ;;  %v534_v13 = vmul.f32 0.1, %v525_v5 }
 0x169   : > { %v2931_v22 = vmax.f32 %v506_v4, %v533_v7  ;;  %v2933_v23 = vmax.f32 %v525_v5, %v534_v13 }
 0x16b   : > { %684 = vrot.lane.b32.xlu1 %v2847_v42, %s2549_s22  ;;  %588 = vrot.lane.b32.xlu0 %v2847_v42, %s2553_s9  ;;  %4692 = vst [vmem:[#allocation27_spill] sm:$0xff] %v2931_v22 }
 0x16c   : > { %676 = vrot.lane.b32.xlu2 %v2845_v41, %s2549_s22  ;;  %4693 = vst [vmem:[#allocation28_spill] sm:$0xff] %v2933_v23 }
 0x173   : > { %742 = vrot.lane.b32.xlu1 %v2873_v55, %s2548_s19  ;;  %646 = vrot.lane.b32.xlu0 %v2873_v55, %s2551_s29 }
 0x174   : > { %654 = vrot.lane.b32.xlu2 %v2875_v56, %s2551_s29 }
 0x17b   : > { %614 = vrot.lane.b32.xlu1 %v2873_v55, %s2550_s23  ;;  %750 = vrot.lane.b32.xlu0 %v2875_v56, %s2548_s19 }
 0x17c   : > { %710 = vrot.lane.b32.xlu2 %v2873_v55, %s2546_s16 }
 0x183   : > { %718 = vrot.lane.b32.xlu1 %v2875_v56, %s2546_s16  ;;  %622 = vrot.lane.b32.xlu0 %v2875_v56, %s2550_s23 }
 0x184   : > { %582 = vrot.lane.b32.xlu2 %v2873_v55, %s2553_s9 }
 0x18b   : > { %590 = vrot.lane.b32.xlu1 %v2875_v56, %s2553_s9  ;;  %678 = vrot.lane.b32.xlu0 %v2873_v55, %s2549_s22 }
 0x18c   : > { %686 = vrot.lane.b32.xlu2 %v2875_v56, %s2549_s22 }
 0x193   : > { %744 = vrot.lane.b32.xlu1 %v2901_v63, %s2548_s19  ;;  %752 = vrot.lane.b32.xlu0 %v2903_v0, %s2548_s19 }
 0x194   : > { %648 = vrot.lane.b32.xlu2 %v2901_v63, %s2551_s29 }
 0x19b   : > { %616 = vrot.lane.b32.xlu1 %v2901_v63, %s2550_s23  ;;  %624 = vrot.lane.b32.xlu0 %v2903_v0, %s2550_s23 }
 0x19c   : > { %656 = vrot.lane.b32.xlu2 %v2903_v0, %s2551_s29 }
 0x1a3   : > { %720 = vrot.lane.b32.xlu1 %v2903_v0, %s2546_s16  ;;  %680 = vrot.lane.b32.xlu0 %v2901_v63, %s2549_s22 }
 0x1a4   : > { %712 = vrot.lane.b32.xlu2 %v2901_v63, %s2546_s16 }
 0x1ab   : > { %592 = vrot.lane.b32.xlu1 %v2903_v0, %s2553_s9  ;;  %552 = vrot.lane.b32.xlu0 %v2901_v63, %s2552_s8 }
 0x1ac   : > { %584 = vrot.lane.b32.xlu2 %v2901_v63, %s2553_s9 }
 0x1ae   : > { %v2929_v21 = vpop.permute.xlu2 %644 }
 0x1b3   : > { %650 = vrot.lane.b32.xlu1 %v2931_v22, %s2551_s29  ;;  %658 = vrot.lane.b32.xlu0 %v2933_v23, %s2551_s29 }
 0x1b4   : > { %688 = vrot.lane.b32.xlu2 %v2903_v0, %s2549_s22 }
 0x1b6   : > { %v2941_v24 = vpop.permute.xlu2 %748 }
 0x1bb   : > { %754 = vrot.lane.b32.xlu1 %v2933_v23, %s2548_s19  ;;  %714 = vrot.lane.b32.xlu0 %v2931_v22, %s2546_s16 }
 0x1bc   : > { %746 = vrot.lane.b32.xlu2 %v2931_v22, %s2548_s19 }
 0x1be   : > { %v2949_v8 = vpop.permute.xlu2 %620 }
 0x1c3   : > { %626 = vrot.lane.b32.xlu1 %v2933_v23, %s2550_s23  ;;  %586 = vrot.lane.b32.xlu0 %v2931_v22, %s2553_s9 }
 0x1c4   : > { %618 = vrot.lane.b32.xlu2 %v2931_v22, %s2550_s23 }
 0x1c5   : > { %v2957_v25 = vpop.permute.xlu1 %652  ;;  %v2959_v26 = vpop.permute.xlu0 %740 }
 0x1c6   : > { %v2961_v9 = vpop.permute.xlu2 %676 }
 0x1cb   : > { %548 = vrot.lane.b32.xlu1 %v2845_v41, %s2552_s8  ;;  %690 = vrot.lane.b32.xlu0 %v2933_v23, %s2549_s22 }
 0x1cc   : > { %722 = vrot.lane.b32.xlu2 %v2933_v23, %s2546_s16 }
 0x1cd   : > { %v2969_v27 = vpop.permute.xlu1 %708  ;;  %v2971_v28 = vpop.permute.xlu0 %612 }
 0x1ce   : > { %v655_v29 = vpop.permute.xlu2 %654 }
 0x1d3   : > { %682 = vrot.lane.b32.xlu1 %v2931_v22, %s2549_s22  ;;  %562 = vrot.lane.b32.xlu0 %v2933_v23, %s2552_s8 }
 0x1d4   : > { %594 = vrot.lane.b32.xlu2 %v2933_v23, %s2553_s9 }
 0x1d5   : > { %v2979_v30 = vpop.permute.xlu1 %580  ;;  %v2981_v31 = vpop.permute.xlu0 %716 }
 0x1d6   : > { %v2983_v32 = vpop.permute.xlu2 %710 }
 0x1db   : > { %554 = vrot.lane.b32.xlu1 %v2931_v22, %s2552_s8  ;;  %556 = vrot.lane.b32.xlu0 %v2847_v42, %s2552_s8 }
 0x1dc   : > { %560 = vrot.lane.b32.xlu2 %v2903_v0, %s2552_s8 }
 0x1dd   : > { %v2991_v33 = vpop.permute.xlu1 %684  ;;  %v2993_v34 = vpop.permute.xlu0 %588 }
 0x1de   : > { %v2995_v37 = vpop.permute.xlu2 %582 }
 0x1e3   : > { %558 = vrot.lane.b32.xlu1 %v2875_v56, %s2552_s8  ;;  %772 = vrot.lane.b32.xlu0 %v2845_v41, %s2547_s18 }
 0x1e4   : > { %550 = vrot.lane.b32.xlu2 %v2873_v55, %s2552_s8 }
 0x1e5   : > { %v3003_v38 = vpop.permute.xlu1 %742  ;;  %v647_v39 = vpop.permute.xlu0 %646 }
 0x1e6   : > { %v3005_v40 = vpop.permute.xlu2 %686  ;;  %v661_v36 = vsel %vm380_vm5, %v647_v39, %v655_v29  ;;  %v665_v11 = vsel %vm380_vm5, %v655_v29, %v647_v39  ;;  %v660_v29 = vsel %vm380_vm5, %v2929_v21, %v2957_v25  ;;  %v664_v39 = vsel %vm380_vm5, %v2957_v25, %v2929_v21 }
 0x1eb   : > { %784 = vrot.lane.b32.xlu1 %v2903_v0, %s2547_s18  ;;  %778 = vrot.lane.b32.xlu0 %v2931_v22, %s2547_s18 }
 0x1ec   : > { %776 = vrot.lane.b32.xlu2 %v2901_v63, %s2547_s18 }
 0x1ed   : > { %v3013_v43 = vpop.permute.xlu1 %614  ;;  %v3015_v44 = vpop.permute.xlu0 %750 }
 0x1ee   : > { %v649_v45 = vpop.permute.xlu2 %648 }
 0x1f3   : > { %774 = vrot.lane.b32.xlu1 %v2873_v55, %s2547_s18  ;;  %782 = vrot.lane.b32.xlu0 %v2875_v56, %s2547_s18 }
 0x1f4   : > { %786 = vrot.lane.b32.xlu2 %v2933_v23, %s2547_s18 }
 0x1f5   : > { %v3023_v46 = vpop.permute.xlu1 %718  ;;  %v3025_v47 = vpop.permute.xlu0 %622 }
 0x1f6   : > { %v657_v48 = vpop.permute.xlu2 %656 }
 0x1f7   : > { %v662_v56 = vsel %vm380_vm5, %v649_v45, %v657_v48 }
 0x1fb   : > { %860 = vperm.xlu1 %2368, %v2161_v49   ;;  %850 = vperm.xlu0 %2370, %v2159_v50  }
 0x1fc   : > { %780 = vrot.lane.b32.xlu2 %v2847_v42, %s2547_s18  ;;  %v666_v42 = vsel %vm380_vm5, %v657_v48, %v649_v45  ;;  %v673_v48 = vmul.f32 %v662_v56, %v2799_v54  ;;  %v669_v56 = vmul.f32 %v660_v29, %v2799_v54 }
 0x1fd   : > { %v3035_v57 = vpop.permute.xlu1 %590  ;;  %v3037_v58 = vpop.permute.xlu0 %678  ;;  %v672_v55 = vmul.f32 %v666_v42, %v2793_v52  ;;  %v670_v42 = vmul.f32 %v665_v11, %v2793_v52  ;;  %v757_v11 = vsel %vm413_vm0, %v3003_v38, %v3015_v44 }
 0x1fe   : > { %v3039_v59 = vpop.permute.xlu2 %712 }
 0x203   : > { %855 = vperm.xlu1 %2368, %v2160_v60  }
 0x204   : > { %865 = vperm.xlu2 %2369, %v2162_v61  }
 0x205   : > { %v3047_v62 = vpop.permute.xlu1 %744  ;;  %v3049_v1 = vpop.permute.xlu0 %752 }
 0x206   : > { %v3051_v2 = vpop.permute.xlu2 %584 }
 0x20d   : > { %v617_v3 = vpop.permute.xlu1 %616  ;;  %v625_v4 = vpop.permute.xlu0 %624 }
 0x20e   : > { %v3053_v5 = vpop.permute.xlu2 %688 }
 0x215   : > { %v3055_v7 = vpop.permute.xlu1 %720  ;;  %v3057_v13 = vpop.permute.xlu0 %680 }
 0x216   : > { %v3059_v49 = vpop.permute.xlu2 %746 }
 0x21d   : > { %v3061_v50 = vpop.permute.xlu1 %592  ;;  %v3063_v60 = vpop.permute.xlu0 %552 }
 0x21e   : > { %v619_v61 = vpop.permute.xlu2 %618 }
 0x225   : > { %v651_v23 = vpop.permute.xlu1 %650  ;;  %v659_v0 = vpop.permute.xlu0 %658 }
 0x226   : > { %v663_v10 = vsel %vm380_vm5, %v651_v23, %v659_v0  ;;  %v3075_v16 = vpop.permute.xlu2 %722  ;;  %v667_v17 = vsel %vm380_vm5, %v659_v0, %v651_v23  ;;  %v758_v23 = vsel %vm413_vm0, %v3047_v62, %v3049_v1 }
 0x227   : > { %v674_v45 = vmul.f32 %v667_v17, %v2793_v52  ;;  %v675_v41 = vmul.f32 %v663_v10, %v2799_v54  ;;  %v671_v17 = vmul.f32 %v661_v36, %v2799_v54  ;;  %v668_v10 = vmul.f32 %v664_v39, %v2793_v52 }
 0x228   : > { %v768_v25 = vmul.f32 %v758_v23, %v2740_v15  ;;  %v766_v39 = vmul.f32 %v757_v11, %v2740_v15  ;;  %v725_v23 = vsel %vm402_vm1, %v2983_v32, %v3023_v46 }
 0x229   : > { %v818_v22 = vpack.c.bf16 %v674_v45, %v672_v55  ;;  %v819_v0 = vpack.c.bf16 %v675_v41, %v673_v48  ;;  %v816_v41 = vpack.c.bf16 %v670_v42, %v668_v10  ;;  %v817_v55 = vpack.c.bf16 %v671_v17, %v669_v56 }
 0x22a   : > { %v756_v48 = vsel %vm413_vm0, %v2959_v26, %v2941_v24  ;;  %v634_v42 = vsel %vm369_vm6, %v625_v4, %v617_v3  ;;  %v630_v10 = vsel %vm369_vm6, %v617_v3, %v625_v4  ;;  %v726_v56 = vsel %vm402_vm1, %v3039_v59, %v3055_v7 }
 0x22b   : > { %905 = vmatpush.bf16.msra.mxu2 %v818_v22  ;;  %962 = vmatpush.bf16.msrb.mxu1 %v819_v0  ;;  %v764_v17 = vmul.f32 %v756_v48, %v2740_v15  ;;  %v629_v4 = vsel %vm369_vm6, %v3013_v43, %v3025_v47  ;;  %v640_v48 = vmul.f32 %v634_v42, %v2790_v51 }
 0x22d   : > { %v3099_v63 = vpop.permute.xlu1 %754  ;;  %v3101_v21 = vpop.permute.xlu0 %714 }
 0x22e   : > { %v595_v36 = vpop.permute.xlu2 %594  ;;  %v759_v22 = vsel %vm413_vm0, %v3059_v49, %v3099_v63  ;;  %v727_v0 = vsel %vm402_vm1, %v3101_v21, %v3075_v16 }
 0x22f   : > { %906 = vmatpush.bf16.msra.mxu2 %v816_v41  ;;  %963 = vmatpush.bf16.msrb.mxu1 %v817_v55  ;;  %v770_v45 = vmul.f32 %v759_v22, %v2740_v15  ;;  %v633_v41 = vsel %vm369_vm6, %v3025_v47, %v3013_v43  ;;  %v832_v22 = vpack.c.bf16 %v766_v39, %v764_v17 }
 0x230   : > { %v738_v3 = vmul.f32 %v727_v0, %v2737_v14  ;;  %v736_v39 = vmul.f32 %v726_v56, %v2737_v14  ;;  %v641_v0 = vmul.f32 %v630_v10, %v2796_v53  ;;  %v628_v43 = vsel %vm369_vm6, %v2971_v28, %v2949_v8 }
 0x231   : > { %v834_v29 = vpack.c.bf16 %v770_v45, %v768_v25  ;;  %v632_v47 = vsel %vm369_vm6, %v2949_v8, %v2971_v28  ;;  %v638_v10 = vmul.f32 %v633_v41, %v2790_v51  ;;  %v639_v15 = vmul.f32 %v629_v4, %v2796_v53 }
 0x232   : > { %v636_v28 = vmul.f32 %v632_v47, %v2790_v51  ;;  %v602_v41 = vsel %vm358_vm8, %v3061_v50, %v3051_v2 }
 0x233   : > { %924 = vmatpush.bf16.msra.mxu3 %v834_v29 }
 0x234   : > { %v812_v4 = vpack.c.bf16 %v638_v10, %v636_v28 }
 0x235   : > { %v627_v55 = vpop.permute.xlu1 %626  ;;  %v587_v11 = vpop.permute.xlu0 %586 }
 0x236   : > { %v631_v25 = vsel %vm369_vm6, %v619_v61, %v627_v55  ;;  %v635_v45 = vsel %vm369_vm6, %v627_v55, %v619_v61  ;;  %v724_v61 = vsel %vm402_vm1, %v2969_v27, %v2981_v31  ;;  %v561_v42 = vpop.permute.xlu2 %560  ;;  %v830_v55 = vpack.c.bf16 %v738_v3, %v736_v39 }
 0x237   : > { %925 = vmatpush.bf16.msra.mxu3 %v832_v22  ;;  %v642_v29 = vmul.f32 %v635_v45, %v2790_v51  ;;  %v643_v17 = vmul.f32 %v631_v25, %v2796_v53  ;;  %v734_v25 = vmul.f32 %v725_v23, %v2737_v14  ;;  %v603_v45 = vsel %vm358_vm8, %v595_v36, %v587_v11 }
 0x238   : > { %v599_v8 = vsel %vm358_vm8, %v587_v11, %v595_v36  ;;  %v732_v54 = vmul.f32 %v724_v61, %v2737_v14  ;;  %v637_v23 = vmul.f32 %v628_v43, %v2796_v53  ;;  %v598_v3 = vsel %vm358_vm8, %v3051_v2, %v3061_v50 }
 0x239   : > { %v814_v56 = vpack.c.bf16 %v642_v29, %v640_v48  ;;  %v815_v22 = vpack.c.bf16 %v643_v17, %v641_v0  ;;  %v610_v29 = vmul.f32 %v603_v45, %v2825_v18  ;;  %v601_v39 = vsel %vm358_vm8, %v3035_v57, %v2995_v37 }
 0x23a   : > { %v828_v48 = vpack.c.bf16 %v734_v25, %v732_v54  ;;  %v813_v0 = vpack.c.bf16 %v639_v15, %v637_v23  ;;  %v611_v17 = vmul.f32 %v599_v8, %v2831_v20  ;;  %v597_v2 = vsel %vm358_vm8, %v2995_v37, %v3035_v57 }
 0x23b   : > { %907 = vmatpush.bf16.msra.mxu2 %v814_v56  ;;  %926 = vmatpush.bf16.msra.mxu3 %v830_v55  ;;  %v608_v50 = vmul.f32 %v602_v41, %v2825_v18  ;;  %v600_v54 = vsel %vm358_vm8, %v2993_v34, %v2979_v30  ;;  %v609_v43 = vmul.f32 %v598_v3, %v2831_v20 }
 0x23c   : > { %964 = vmatpush.bf16.msrb.mxu1 %v815_v22  ;;  %v596_v15 = vsel %vm358_vm8, %v2979_v30, %v2993_v34  ;;  %v606_v37 = vmul.f32 %v601_v39, %v2825_v18  ;;  %v607_v10 = vmul.f32 %v597_v2, %v2831_v20  ;;  %v604_v56 = vmul.f32 %v600_v54, %v2825_v18 }
 0x23d   : > { %v3183_v36 = vpop.permute.xlu1 %548  ;;  %v3185_v11 = vpop.permute.xlu0 %690  ;;  %v810_v47 = vpack.c.bf16 %v610_v29, %v608_v50  ;;  %v811_v61 = vpack.c.bf16 %v611_v17, %v609_v43  ;;  %v694_v55 = vsel %vm391_vm4, %v3057_v13, %v3053_v5  ;;  %v605_v22 = vmul.f32 %v596_v15, %v2831_v20 }
 0x23e   : > { %v551_v57 = vpop.permute.xlu2 %550  ;;  %v808_v34 = vpack.c.bf16 %v606_v37, %v604_v56  ;;  %v693_v45 = vsel %vm391_vm4, %v3037_v58, %v3005_v40  ;;  %v704_v41 = vmul.f32 %v694_v55, %v2768_v35  ;;  %v692_v3 = vsel %vm391_vm4, %v2961_v9, %v2991_v33  ;;  %v4695_v56 = vld [vmem:[#allocation27_spill] sm:$0xff] }
 0x23f   : > { %908 = vmatpush.bf16.msra.mxu2 %v812_v4  ;;  %927 = vmatpush.bf16.msra.mxu3 %v828_v48  ;;  %v809_v28 = vpack.c.bf16 %v607_v10, %v605_v22  ;;  %v702_v48 = vmul.f32 %v693_v45, %v2768_v35  ;;  %v700_v29 = vmul.f32 %v692_v3, %v2768_v35  ;;  %v2167_v45 = vld [vmem:[%s4605_s3 + $0xc] sm:$0xf0]  ;;  %v4696_v3 = vld [vmem:[#allocation21_spill] sm:$0xff] }
 0x240   : > { %965 = vmatpush.bf16.msrb.mxu1 %v813_v0  ;;  %v566_v39 = vsel %vm347_vm7, %v3063_v60, %v561_v42  ;;  %v570_v0 = vsel %vm347_vm7, %v561_v42, %v3063_v60  ;;  %v4694_v42 = vld [vmem:[#allocation25_spill] sm:$0xff] }
 0x241   : > { %v824_v54 = vpack.c.bf16 %v702_v48, %v700_v29  ;;  %v822_v55 = vpack.c.bf16 %v4695_v56, %v4694_v42 }
 0x243   : > { %909 = vmatpush.bf16.msra.mxu2 %v810_v47  ;;  %v576_v47 = vmul.f32 %v570_v0, %v2821_v12 }
 0x244   : > { %966 = vmatpush.bf16.msrb.mxu1 %v811_v61  ;;  %v577_v61 = vmul.f32 %v566_v39, %v2828_v19  ;;  %v4698_v39 = vld [vmem:[#allocation18_spill] sm:$0xff] }
 0x245   : > { %v3215_v25 = vpop.permute.xlu1 %682  ;;  %v563_v30 = vpop.permute.xlu0 %562 }
 0x246   : > { %v695_v8 = vsel %vm391_vm4, %v3215_v25, %v3185_v11  ;;  %v777_v17 = vpop.permute.xlu2 %776 }
 0x247   : > { %910 = vmatpush.bf16.msra.mxu2 %v808_v34  ;;  %v706_v23 = vmul.f32 %v695_v8, %v2768_v35  ;;  %v763_v34 = vsel %vm413_vm0, %v3099_v63, %v3059_v49  ;;  %v761_v63 = vsel %vm413_vm0, %v3015_v44, %v3003_v38  ;;  %v762_v49 = vsel %vm413_vm0, %v3049_v1, %v3047_v62 }
 0x248   : > { %967 = vmatpush.bf16.msrb.mxu1 %v809_v28  ;;  %v771_v0 = vmul.f32 %v763_v34, %v4698_v39 }
 0x249   : > { %v826_v4 = vpack.c.bf16 %v706_v23, %v704_v41 }
 0x24b   : > { %928 = vmatpush.bf16.msra.mxu3 %v826_v4  ;;  %v4697_v4 = vld [vmem:[#allocation23_spill] sm:$0xff] }
 0x24c   : > { %v820_v48 = vpack.c.bf16 %v4697_v4, %v4696_v3 }
 0x24d   : > { %v555_v2 = vpop.permute.xlu1 %554  ;;  %v557_v50 = vpop.permute.xlu0 %556 }
 0x24e   : > { %v567_v43 = vsel %vm347_vm7, %v555_v2, %v563_v30  ;;  %v571_v15 = vsel %vm347_vm7, %v563_v30, %v555_v2  ;;  %v2262_v30 = vld [vmem:[%s4605_s3 + $0x4] sm:$0xf]  ;;  %v564_v8 = vsel %vm347_vm7, %v3183_v36, %v557_v50  ;;  %v568_v28 = vsel %vm347_vm7, %v557_v50, %v3183_v36  ;;  %v787_v38 = vpop.permute.xlu2 %786 }
 0x24f   : > { %929 = vmatpush.bf16.msra.mxu3 %v824_v54  ;;  %v578_v37 = vmul.f32 %v571_v15, %v2821_v12  ;;  %v579_v10 = vmul.f32 %v567_v43, %v2828_v19  ;;  %v3280_v2 = vor.u32 %v2262_v30, %v2167_v45  ;;  %v572_v44 = vmul.f32 %v568_v28, %v2821_v12  ;;  %v2165_v54 = vld [vmem:[%s4605_s3] sm:$0xf] }
 0x250   : > { %v573_v1 = vmul.f32 %v564_v8, %v2828_v19  ;;  %v760_v43 = vsel %vm413_vm0, %v2941_v24, %v2959_v26  ;;  %v769_v15 = vmul.f32 %v762_v49, %v4698_v39  ;;  %v729_v24 = vsel %vm402_vm1, %v3023_v46, %v2983_v32  ;;  %v4700_v46 = vld [vmem:[#allocation14_spill] sm:$0xff] }
 0x251   : > { %v806_v60 = vpack.c.bf16 %v578_v37, %v576_v47  ;;  %v807_v22 = vpack.c.bf16 %v579_v10, %v577_v61  ;;  %v767_v61 = vmul.f32 %v761_v63, %v4698_v39  ;;  %v731_v10 = vsel %vm402_vm1, %v3075_v16, %v3101_v21 }
 0x252   : > { %v765_v56 = vmul.f32 %v760_v43, %v4698_v39  ;;  %v730_v26 = vsel %vm402_vm1, %v3055_v7, %v3039_v59  ;;  %v4701_v7 = vld [vmem:[#allocation15_spill] sm:$0xff] }
 0x253   : > { %911 = vmatpush.bf16.msra.mxu2 %v806_v60  ;;  %930 = vmatpush.bf16.msra.mxu3 %v822_v55  ;;  %v835_v60 = vpack.c.bf16 %v771_v0, %v769_v15  ;;  %v699_v0 = vsel %vm391_vm4, %v3185_v11, %v3215_v25  ;;  %v697_v11 = vsel %vm391_vm4, %v3005_v40, %v3037_v58  ;;  %v4702_v43 = vld [vmem:[#allocation19_spill] sm:$0xff]  ;;  %v2177_v40 = vld [vmem:[%s4605_s3 + $0x18] sm:$0xf] }
 0x254   : > { %968 = vmatpush.bf16.msrb.mxu1 %v807_v22  ;;  %v833_v55 = vpack.c.bf16 %v767_v61, %v765_v56  ;;  %v4699_v22 = vld [vmem:[#allocation17_spill] sm:$0xff]  ;;  %v698_v25 = vsel %vm391_vm4, %v3053_v5, %v3057_v13  ;;  %v707_v15 = vmul.f32 %v699_v0, %v4702_v43  ;;  %v2266_v61 = vld [vmem:[%s4605_s3 + $0x20] sm:$0xf0]  ;;  %v696_v56 = vsel %vm391_vm4, %v2991_v33, %v2961_v9  ;;  %v4704_v33 = vld [vmem:[#allocation28_spill] sm:$0xff] }
 0x255   : > { %v559_v41 = vpop.permute.xlu1 %558  ;;  %v773_v23 = vpop.permute.xlu0 %772  ;;  %v739_v34 = vmul.f32 %v731_v10, %v4699_v22  ;;  %v2173_v10 = vld [vmem:[%s4605_s3 + $0x8] sm:$0xf]  ;;  %v4703_v9 = vld [vmem:[#allocation26_spill] sm:$0xff] }
 0x256   : > { %v565_v29 = vsel %vm347_vm7, %v551_v57, %v559_v41  ;;  %v569_v36 = vsel %vm347_vm7, %v559_v41, %v551_v57  ;;  %v2263_v57 = vld [vmem:[%s4605_s3 + $0x8] sm:$0xf0]  ;;  %v737_v41 = vmul.f32 %v730_v26, %v4699_v22  ;;  %v781_v3 = vpop.permute.xlu2 %780 }
 0x257   : > { %931 = vmatpush.bf16.msra.mxu3 %v820_v48  ;;  %v574_v62 = vmul.f32 %v569_v36, %v2821_v12  ;;  %v575_v50 = vmul.f32 %v565_v29, %v2828_v19  ;;  %v2166_v42 = vor.u32 %v2263_v57, %v2165_v54  ;;  %v735_v29 = vmul.f32 %v729_v24, %v4699_v22 }
 0x258   : > { %v831_v36 = vpack.c.bf16 %v739_v34, %v737_v41  ;;  %v703_v34 = vmul.f32 %v697_v11, %v4702_v43 }
 0x259   : > { %v804_v47 = vpack.c.bf16 %v574_v62, %v572_v44  ;;  %v805_v37 = vpack.c.bf16 %v575_v50, %v573_v1  ;;  %v788_v44 = vsel %vm424_vm2, %v773_v23, %v781_v3  ;;  %v792_v62 = vsel %vm424_vm2, %v781_v3, %v773_v23 }
 0x25a   : > { %932 = vmatmul.bf16.vlgmr.msra.gmra.mxu3 %v3280_v2  ;;  %v797_v5 = vmul.f32 %v4701_v7, %v792_v62 }
 0x25b   : > { %912 = vmatpush.bf16.msra.mxu2 %v804_v47  ;;  %969 = vmatpush.bf16.msrb.mxu1 %v805_v37  ;;  %v796_v47 = vmul.f32 %v4700_v46, %v788_v44 }
 0x25d   : > { %v785_v16 = vpop.permute.xlu1 %784  ;;  %v779_v21 = vpop.permute.xlu0 %778 }
 0x25e   : > { %v790_v30 = vsel %vm424_vm2, %v777_v17, %v785_v16  ;;  %v794_v45 = vsel %vm424_vm2, %v785_v16, %v777_v17  ;;  %v791_v8 = vsel %vm424_vm2, %v779_v21, %v787_v38  ;;  %v795_v32 = vsel %vm424_vm2, %v787_v38, %v779_v21  ;;  %913 = vmatmul.bf16.vlgmr.msra.gmra.mxu2 %v2166_v42 }
 0x25f   : > { %981 = vmatpush.bf16.msrb.mxu2 %v835_v60  ;;  %v800_v59 = vmul.f32 %v4700_v46, %v790_v30  ;;  %v801_v28 = vmul.f32 %v4701_v7, %v794_v45  ;;  %v802_v63 = vmul.f32 %v4700_v46, %v791_v8  ;;  %v803_v49 = vmul.f32 %v4701_v7, %v795_v32  ;;  %v2264_v60 = vld [vmem:[%s4605_s3 + $0x10] sm:$0xf0]  ;;  %v4705_v32 = vld [vmem:[#allocation22_spill] sm:$0xff] }
 0x260   : > { %970 = vmatmul.bf16.vlgmr.msrb.gmra.mxu1 %v2166_v42  ;;  %v728_v17 = vsel %vm402_vm1, %v2981_v31, %v2969_v27  ;;  %v2265_v27 = vld [vmem:[%s4605_s3 + $0x1c] sm:$0xf]  ;;  %v2179_v31 = vld [vmem:[%s4605_s3 + $0x24] sm:$0xf0]  ;;  %v705_v42 = vmul.f32 %v698_v25, %v4702_v43  ;;  %v2178_v21 = vor.u32 %v2266_v61, %v2177_v40  ;;  %v701_v30 = vmul.f32 %v696_v56, %v4702_v43 }
 0x261   : > { %v838_v4 = vpack.c.bf16 %v802_v63, %v800_v59  ;;  %v839_v48 = vpack.c.bf16 %v803_v49, %v801_v28  ;;  %v733_v38 = vmul.f32 %v728_v17, %v4699_v22  ;;  %v2182_v58 = vor.u32 %v2265_v27, %v2179_v31  ;;  %v2267_v28 = vld [vmem:[%s4605_s3 + $0x28] sm:$0xf0] }
 0x262   : > { %v827_v16 = vpack.c.bf16 %v707_v15, %v705_v42  ;;  %v825_v45 = vpack.c.bf16 %v703_v34, %v701_v30  ;;  %v823_v8 = vpack.c.bf16 %v4704_v33, %v4703_v9 }
 0x263   : > { %982 = vmatpush.bf16.msrb.mxu2 %v833_v55  ;;  %949 = vmatpush.bf16.msrb.mxu0 %v838_v4  ;;  %v829_v54 = vpack.c.bf16 %v735_v29, %v733_v38  ;;  %v2174_v55 = vor.u32 %v2264_v60, %v2173_v10 }
 0x264   : > { %1006 = vmatpush.bf16.msrb.mxu3 %v839_v48 }
 0x265   : > { %v775_v1 = vpop.permute.xlu1 %774  ;;  %v783_v50 = vpop.permute.xlu0 %782 }
 0x266   : > { %v789_v57 = vsel %vm424_vm2, %v775_v1, %v783_v50  ;;  %v793_v23 = vsel %vm424_vm2, %v783_v50, %v775_v1 }
 0x267   : > { %983 = vmatpush.bf16.msrb.mxu2 %v831_v36  ;;  %v798_v13 = vmul.f32 %v4700_v46, %v789_v57  ;;  %v799_v37 = vmul.f32 %v4701_v7, %v793_v23  ;;  %v4706_v46 = vld [vmem:[#allocation24_spill] sm:$0xff]  ;;  %v2185_v7 = vld [vmem:[%s4605_s3 + $0x20] sm:$0xf] }
 0x268   : > { %v821_v59 = vpack.c.bf16 %v4706_v46, %v4705_v32  ;;  %v2186_v63 = vor.u32 %v2267_v28, %v2185_v7 }
 0x269   : > { %v836_v24 = vpack.c.bf16 %v798_v13, %v796_v47  ;;  %v837_v26 = vpack.c.bf16 %v799_v37, %v797_v5  ;;  %v866_v37 = vpop.permute.xlu2 %865 }
 0x26a   : > { %937 = vmatmul.bf16.gmra.mxu3 %v2182_v58 }
 0x26b   : > { %984 = vmatpush.bf16.msrb.mxu2 %v829_v54  ;;  %950 = vmatpush.bf16.msrb.mxu0 %v836_v24 }
 0x26c   : > { %1007 = vmatpush.bf16.msrb.mxu3 %v837_v26 }
 0x26d   : > { %v851_v17 = vpop.permute.xlu0 %850  ;;  %v3397_v3 = vpop.permute.xlu1 %860 }
 0x26e   : > { %918 = vmatmul.bf16.gmra.mxu2 %v2178_v21  ;;  %2187 = vmatmul.msk.bf16.vlgmr.msrb.gmra.mxu0 %vm898_vm10, %v2174_v55 }
 0x26f   : > { %985 = vmatpush.bf16.msrb.mxu2 %v827_v16 }
 0x270   : > { %975 = vmatmul.bf16.gmra.mxu1 %v2178_v21 }
 0x273   : > { %986 = vmatpush.bf16.msrb.mxu2 %v825_v45 }
 0x275   : > { %v856_v31 = vpop.permute.xlu1 %855 }
 0x277   : > { %987 = vmatpush.bf16.msrb.mxu2 %v823_v8 }
 0x27a   : > { %2189 = vmatmul.msk.bf16.vlgmr.msrb.gmra.mxu3 %vm898_vm10, %v2174_v55 }
 0x27b   : > { %988 = vmatpush.bf16.msrb.mxu2 %v821_v59 }
 0x27e   : > { %2188 = vmatmul.msk.bf16.gmra.mxu0 %vm898_vm10, %v2186_v63  ;;  %989 = vmatmul.bf16.vlgmr.msrb.gmra.mxu2 %v3280_v2 }
 0x28a   : > { %2190 = vmatmul.msk.bf16.gmra.mxu3 %vm898_vm10, %v2186_v63 }
 0x28e   : > { %994 = vmatmul.bf16.gmra.mxu2 %v2182_v58 }
 0x2dd   : > { %v933_v4 = vpop.f32.mrf.mxu3  ;;  %v971_v26 = vpop.f32.mrf.mxu1 }
 0x2de   : > { %v972_v55 = vadd.f32 %v971_v26, %v851_v17 }
 0x2e1   : > { %v914_v49 = vpop.f32.mrf.mxu2 }
 0x2e2   : > { %v915_v41 = vadd.f32 %v914_v49, %v851_v17 }
 0x2e4   : > { %v934_v48 = vadd.f32 %v933_v4, %v915_v41 }
 0x2e5   : > { %v935_v2 = vpop.f32.mrf.mxu3  ;;  %v973_v33 = vpop.f32.mrf.mxu1 }
 0x2e6   : > { %v974_v46 = vadd.f32 %v973_v33, %v856_v31 }
 0x2e9   : > { %v916_v38 = vpop.f32.mrf.mxu2 }
 0x2ea   : > { %v917_v44 = vadd.f32 %v916_v38, %v856_v31 }
 0x2eb   : > { %v952_v29 = vpop.f32.mrf.mxu0 }
 0x2ec   : > { %v953_v36 = vadd.f32 %v952_v29, %v934_v48  ;;  %v936_v11 = vadd.f32 %v935_v2, %v917_v44 }
 0x2ed   : > { %v938_v23 = vpop.f32.mrf.mxu3  ;;  %v976_v49 = vpop.f32.mrf.mxu1 }
 0x2ee   : > { %v1019_v0 = vmul.f32 0.1, %v953_v36  ;;  %v977_v4 = vadd.f32 %v976_v49, %v3397_v3  ;;  %v2194_v49 = vld [vmem:[%s4608_s6 + $0x58] sm:$0xff] }
 0x2f0   : > { %v3399_v27 = vmax.f32 %v953_v36, %v1019_v0 }
 0x2f1   : > { %v919_v50 = vpop.f32.mrf.mxu2 }
 0x2f2   : > { %4707 = vst [vmem:[#allocation25_spill] sm:$0xff] %v3399_v27  ;;  %1200 = vrot.lane.b32.xlu0 %v3399_v27, %s2546_s16  ;;  %1232 = vrot.lane.b32.xlu2 %v3399_v27, %s2548_s19  ;;  %v920_v57 = vadd.f32 %v919_v50, %v3397_v3 }
 0x2f3   : > { %1136 = vrot.lane.b32.xlu1 %v3399_v27, %s2551_s29  ;;  %v954_v62 = vpop.f32.mrf.mxu0 }
 0x2f4   : > { %v955_v25 = vadd.f32 %v954_v62, %v936_v11  ;;  %v939_v40 = vadd.f32 %v938_v23, %v920_v57 }
 0x2f5   : > { %v940_v10 = vpop.f32.mrf.mxu3  ;;  %v978_v38 = vpop.f32.mrf.mxu1 }
 0x2f6   : > { %v1021_v1 = vmul.f32 0.1, %v955_v25  ;;  %v979_v2 = vadd.f32 %v978_v38, %v866_v37 }
 0x2f8   : > { %v3413_v54 = vmax.f32 %v955_v25, %v1021_v1 }
 0x2f9   : > { %v921_v5 = vpop.f32.mrf.mxu2 }
 0x2fa   : > { %1072 = vrot.lane.b32.xlu0 %v3399_v27, %s2553_s9  ;;  %1104 = vrot.lane.b32.xlu2 %v3399_v27, %s2550_s23  ;;  %4708 = vst [vmem:[#allocation27_spill] sm:$0xff] %v3413_v54  ;;  %v922_v61 = vadd.f32 %v921_v5, %v866_v37 }
 0x2fb   : > { %1168 = vrot.lane.b32.xlu1 %v3399_v27, %s2549_s22  ;;  %v957_v15 = vpop.f32.mrf.mxu0 }
 0x2fc   : > { %v958_v58 = vadd.f32 %v957_v15, %v939_v40  ;;  %v941_v42 = vadd.f32 %v940_v10, %v922_v61 }
 0x2fd   : > { %v1009_v30 = vpop.f32.mrf.mxu3 }
 0x2fe   : > { %v1023_v47 = vmul.f32 0.1, %v958_v58 }
 0x300   : > { %v3428_v13 = vmax.f32 %v958_v58, %v1023_v47 }
 0x301   : > { %v990_v21 = vpop.f32.mrf.mxu2 }
 0x302   : > { %1234 = vrot.lane.b32.xlu0 %v3413_v54, %s2548_s19  ;;  %1138 = vrot.lane.b32.xlu2 %v3413_v54, %s2551_s29  ;;  %4709 = vst [vmem:[#allocation21_spill] sm:$0xff] %v3428_v13  ;;  %v991_v34 = vadd.f32 %v990_v21, %v972_v55 }
 0x303   : > { %1202 = vrot.lane.b32.xlu1 %v3413_v54, %s2546_s16  ;;  %v959_v60 = vpop.f32.mrf.mxu0 }
 0x304   : > { %v960_v56 = vadd.f32 %v959_v60, %v941_v42  ;;  %v1010_v45 = vadd.f32 %v1009_v30, %v991_v34 }
 0x305   : > { %v1011_v7 = vpop.f32.mrf.mxu3 }
 0x306   : > { %v1025_v24 = vmul.f32 0.1, %v960_v56  ;;  %v1020_v9 = vmul.f32 0.1, %v1010_v45 }
 0x308   : > { %v3442_v16 = vmax.f32 %v960_v56, %v1025_v24  ;;  %v3456_v8 = vmax.f32 %v1010_v45, %v1020_v9 }
 0x309   : > { %v992_v32 = vpop.f32.mrf.mxu2 }
 0x30a   : > { %1106 = vrot.lane.b32.xlu0 %v3413_v54, %s2550_s23  ;;  %1170 = vrot.lane.b32.xlu2 %v3413_v54, %s2549_s22  ;;  %4710 = vst [vmem:[#allocation23_spill] sm:$0xff] %v3442_v16  ;;  %v993_v59 = vadd.f32 %v992_v32, %v974_v46 }
 0x30b   : > { %1074 = vrot.lane.b32.xlu1 %v3413_v54, %s2553_s9  ;;  %4711 = vst [vmem:[#allocation14_spill] sm:$0xff] %v3456_v8 }
 0x30c   : > { %v1012_v28 = vadd.f32 %v1011_v7, %v993_v59 }
 0x30d   : > { %v1014_v29 = vpop.f32.mrf.mxu3 }
 0x30e   : > { %v1022_v63 = vmul.f32 0.1, %v1012_v28 }
 0x310   : > { %v3470_v17 = vmax.f32 %v1012_v28, %v1022_v63  ;;  %v2193_v63 = vld [vmem:[%s4608_s6 + $0x50] sm:$0xff] }
 0x311   : > { %v995_v41 = vpop.f32.mrf.mxu2 }
 0x312   : > { %1236 = vrot.lane.b32.xlu0 %v3428_v13, %s2548_s19  ;;  %1140 = vrot.lane.b32.xlu2 %v3428_v13, %s2551_s29  ;;  %4712 = vst [vmem:[#allocation15_spill] sm:$0xff] %v3470_v17  ;;  %v996_v48 = vadd.f32 %v995_v41, %v977_v4 }
 0x313   : > { %1204 = vrot.lane.b32.xlu1 %v3428_v13, %s2546_s16 }
 0x314   : > { %v1015_v36 = vadd.f32 %v1014_v29, %v996_v48 }
 0x315   : > { %v1016_v25 = vpop.f32.mrf.mxu3 }
 0x316   : > { %v1024_v3 = vmul.f32 0.1, %v1015_v36 }
 0x318   : > { %v3487_v31 = vmax.f32 %v1015_v36, %v1024_v3  ;;  %v2192_v36 = vld [vmem:[%s4608_s6 + $0x48] sm:$0xff]  ;;  %v2191_v3 = vld [vmem:[%s4608_s6 + $0x40] sm:$0xff] }
 0x319   : > { %v997_v44 = vpop.f32.mrf.mxu2 }
 0x31a   : > { %1108 = vrot.lane.b32.xlu0 %v3428_v13, %s2550_s23  ;;  %1172 = vrot.lane.b32.xlu2 %v3428_v13, %s2549_s22  ;;  %4713 = vst [vmem:[#allocation26_spill] sm:$0xff] %v3487_v31  ;;  %v998_v62 = vadd.f32 %v997_v44, %v979_v2 }
 0x31b   : > { %1076 = vrot.lane.b32.xlu1 %v3428_v13, %s2553_s9 }
 0x31c   : > { %v1017_v1 = vadd.f32 %v1016_v25, %v998_v62 }
 0x31e   : > { %v1026_v50 = vmul.f32 0.1, %v1017_v1 }
 0x320   : > { %v3505_v23 = vmax.f32 %v1017_v1, %v1026_v50 }
 0x322   : > { %1142 = vrot.lane.b32.xlu0 %v3442_v16, %s2551_s29  ;;  %1206 = vrot.lane.b32.xlu2 %v3442_v16, %s2546_s16  ;;  %4714 = vst [vmem:[#allocation28_spill] sm:$0xff] %v3505_v23 }
 0x323   : > { %1238 = vrot.lane.b32.xlu1 %v3442_v16, %s2548_s19 }
 0x32a   : > { %1174 = vrot.lane.b32.xlu0 %v3442_v16, %s2549_s22  ;;  %1078 = vrot.lane.b32.xlu2 %v3442_v16, %s2553_s9 }
 0x32b   : > { %1110 = vrot.lane.b32.xlu1 %v3442_v16, %s2550_s23 }
 0x332   : > { %1144 = vrot.lane.b32.xlu0 %v3456_v8, %s2551_s29  ;;  %1208 = vrot.lane.b32.xlu2 %v3456_v8, %s2546_s16 }
 0x333   : > { %1240 = vrot.lane.b32.xlu1 %v3456_v8, %s2548_s19 }
 0x33a   : > { %1176 = vrot.lane.b32.xlu0 %v3456_v8, %s2549_s22  ;;  %1080 = vrot.lane.b32.xlu2 %v3456_v8, %s2553_s9 }
 0x33b   : > { %1112 = vrot.lane.b32.xlu1 %v3456_v8, %s2550_s23 }
 0x342   : > { %1210 = vrot.lane.b32.xlu0 %v3470_v17, %s2546_s16  ;;  %1242 = vrot.lane.b32.xlu2 %v3470_v17, %s2548_s19 }
 0x343   : > { %1146 = vrot.lane.b32.xlu1 %v3470_v17, %s2551_s29 }
 0x34a   : > { %1082 = vrot.lane.b32.xlu0 %v3470_v17, %s2553_s9  ;;  %1114 = vrot.lane.b32.xlu2 %v3470_v17, %s2550_s23 }
 0x34b   : > { %1178 = vrot.lane.b32.xlu1 %v3470_v17, %s2549_s22 }
 0x34c   : > { %v3485_v0 = vpop.permute.xlu2 %1232 }
 0x352   : > { %1212 = vrot.lane.b32.xlu0 %v3487_v31, %s2546_s16  ;;  %1244 = vrot.lane.b32.xlu2 %v3487_v31, %s2548_s19 }
 0x353   : > { %1148 = vrot.lane.b32.xlu1 %v3487_v31, %s2551_s29 }
 0x354   : > { %v3495_v11 = vpop.permute.xlu2 %1104 }
 0x35a   : > { %1084 = vrot.lane.b32.xlu0 %v3487_v31, %s2553_s9  ;;  %1116 = vrot.lane.b32.xlu2 %v3487_v31, %s2550_s23 }
 0x35b   : > { %1180 = vrot.lane.b32.xlu1 %v3487_v31, %s2549_s22 }
 0x35c   : > { %v3503_v57 = vpop.permute.xlu2 %1138 }
 0x362   : > { %1246 = vrot.lane.b32.xlu0 %v3505_v23, %s2548_s19  ;;  %1150 = vrot.lane.b32.xlu2 %v3505_v23, %s2551_s29 }
 0x363   : > { %1214 = vrot.lane.b32.xlu1 %v3505_v23, %s2546_s16 }
 0x364   : > { %v1201_v15 = vpop.permute.xlu0 %1200  ;;  %v3513_v40 = vpop.permute.xlu2 %1170 }
 0x365   : > { %v3515_v58 = vpop.permute.xlu1 %1136 }
 0x36a   : > { %1118 = vrot.lane.b32.xlu0 %v3505_v23, %s2550_s23  ;;  %1044 = vrot.lane.b32.xlu2 %v3428_v13, %s2552_s8 }
 0x36b   : > { %1086 = vrot.lane.b32.xlu1 %v3505_v23, %s2553_s9 }
 0x36c   : > { %v1073_v47 = vpop.permute.xlu0 %1072  ;;  %v3523_v5 = vpop.permute.xlu2 %1140 }
 0x36d   : > { %v3525_v37 = vpop.permute.xlu1 %1168 }
 0x372   : > { %1046 = vrot.lane.b32.xlu0 %v3442_v16, %s2552_s8  ;;  %1182 = vrot.lane.b32.xlu2 %v3505_v23, %s2549_s22 }
 0x373   : > { %1052 = vrot.lane.b32.xlu1 %v3487_v31, %s2552_s8 }
 0x374   : > { %v3533_v61 = vpop.permute.xlu0 %1234  ;;  %v3535_v10 = vpop.permute.xlu2 %1172 }
 0x375   : > { %v1203_v60 = vpop.permute.xlu1 %1202 }
 0x37a   : > { %1040 = vrot.lane.b32.xlu0 %v3399_v27, %s2552_s8  ;;  %1054 = vrot.lane.b32.xlu2 %v3505_v23, %s2552_s8 }
 0x37b   : > { %1042 = vrot.lane.b32.xlu1 %v3413_v54, %s2552_s8 }
 0x37c   : > { %v3543_v42 = vpop.permute.xlu0 %1106  ;;  %v3545_v56 = vpop.permute.xlu2 %1206 }
 0x37d   : > { %v1075_v24 = vpop.permute.xlu1 %1074 }
 0x382   : > { %1050 = vrot.lane.b32.xlu0 %v3470_v17, %s2552_s8  ;;  %1048 = vrot.lane.b32.xlu2 %v3456_v8, %s2552_s8 }
 0x383   : > { %1268 = vrot.lane.b32.xlu1 %v3428_v13, %s2547_s18 }
 0x384   : > { %v3553_v26 = vpop.permute.xlu0 %1236  ;;  %v3555_v21 = vpop.permute.xlu2 %1078 }
 0x385   : > { %v3557_v55 = vpop.permute.xlu1 %1204 }
 0x38a   : > { %1276 = vrot.lane.b32.xlu0 %v3487_v31, %s2547_s18  ;;  %1270 = vrot.lane.b32.xlu2 %v3442_v16, %s2547_s18 }
 0x38b   : > { %1278 = vrot.lane.b32.xlu1 %v3505_v23, %s2547_s18 }
 0x38c   : > { %v3565_v34 = vpop.permute.xlu0 %1108  ;;  %v1209_v30 = vpop.permute.xlu2 %1208 }
 0x38d   : > { %v1216_v45 = vsel %vm402_vm1, %v1201_v15, %v1209_v30  ;;  %v1220_v9 = vsel %vm402_vm1, %v1209_v30, %v1201_v15  ;;  %v3571_v33 = vpop.permute.xlu1 %1076 }
 0x38e   : > { %v3645_v50 = vmul.f32 %v1216_v45, %v2737_v14 }
 0x392   : > { %1266 = vrot.lane.b32.xlu0 %v3413_v54, %s2547_s18  ;;  %1264 = vrot.lane.b32.xlu2 %v3399_v27, %s2547_s18 }
 0x393   : > { %1272 = vrot.lane.b32.xlu1 %v3456_v8, %s2547_s18 }
 0x394   : > { %v1143_v32 = vpop.permute.xlu0 %1142  ;;  %v1081_v46 = vpop.permute.xlu2 %1080 }
 0x395   : > { %v1088_v59 = vsel %vm358_vm8, %v1073_v47, %v1081_v46  ;;  %v1092_v7 = vsel %vm358_vm8, %v1081_v46, %v1073_v47  ;;  %v3583_v28 = vpop.permute.xlu1 %1238 }
 0x39a   : > { %1352 = vperm.xlu0 %2370, %v2193_v63   ;;  %1274 = vrot.lane.b32.xlu2 %v3470_v17, %s2547_s18  ;;  %v3648_v17 = vmul.f32 %v1220_v9, %v4699_v22 }
 0x39b   : > { %1357 = vperm.xlu1 %2368, %v2194_v49  }
 0x39c   : > { %v3593_v41 = vpop.permute.xlu0 %1174  ;;  %v3595_v4 = vpop.permute.xlu2 %1242  ;;  %4717 = vst [vmem:[#allocation29_spill] sm:$0xff] %v3648_v17 }
 0x39d   : > { %v1253_v48 = vsel %vm413_vm0, %v3595_v4, %v3533_v61  ;;  %v3601_v29 = vpop.permute.xlu1 %1110 }
 0x39e   : > { %v3618_v25 = vmul.f32 %v1253_v48, %v4698_v39 }
 0x3a0   : > { %4715 = vst [vmem:[#allocation22_spill] sm:$0xff] %v3618_v25 }
 0x3a2   : > { %1347 = vperm.xlu0 %2370, %v2192_v36   ;;  %1342 = vperm.xlu2 %2369, %v2191_v3  }
 0x3a4   : > { %v1145_v38 = vpop.permute.xlu0 %1144  ;;  %v3609_v44 = vpop.permute.xlu2 %1114 }
 0x3a5   : > { %v3611_v2 = vpop.permute.xlu1 %1240 }
 0x3a6   : > { %v1252_v62 = vsel %vm413_vm0, %v3611_v2, %v3485_v0 }
 0x3a7   : > { %v3621_v1 = vmul.f32 %v1252_v62, %v4698_v39 }
 0x3a9   : > { %4716 = vst [vmem:[#allocation24_spill] sm:$0xff] %v3621_v1 }
 0x3ac   : > { %v3625_v15 = vpop.permute.xlu0 %1176  ;;  %v1245_v47 = vpop.permute.xlu2 %1244 }
 0x3ad   : > { %v1188_v30 = vsel %vm391_vm4, %v3625_v15, %v3525_v37  ;;  %v3634_v46 = vsel %vm413_vm0, %v1245_v47, %v3553_v26  ;;  %v3636_v63 = vpop.permute.xlu1 %1112 }
 0x3b4   : > { %v1211_v49 = vpop.permute.xlu0 %1210  ;;  %v3638_v48 = vpop.permute.xlu2 %1116 }
 0x3b5   : > { %v1217_v36 = vsel %vm402_vm1, %v1203_v60, %v1211_v49  ;;  %v1221_v3 = vsel %vm402_vm1, %v1211_v49, %v1203_v60  ;;  %v1147_v62 = vpop.permute.xlu1 %1146 }
 0x3b6   : > { %v3651_v8 = vmul.f32 %v1217_v36, %v2737_v14  ;;  %v3654_v23 = vmul.f32 %v1221_v3, %v4699_v22  ;;  %v3667_v36 = vmul.f32 %v1092_v7, %v2825_v18  ;;  %v3670_v3 = vmul.f32 %v1088_v59, %v2831_v20 }
 0x3b8   : > { %4718 = vst [vmem:[#allocation30_spill] sm:$0xff] %v3654_v23 }
 0x3b9   : > { %4719 = vst [vmem:[#allocation31_spill] sm:$0xff] %v3670_v3 }
 0x3bc   : > { %v1083_v60 = vpop.permute.xlu0 %1082  ;;  %v1151_v17 = vpop.permute.xlu2 %1150 }
 0x3bd   : > { %v1089_v45 = vsel %vm358_vm8, %v1075_v24, %v1083_v60  ;;  %v1093_v9 = vsel %vm358_vm8, %v1083_v60, %v1075_v24  ;;  %v3664_v49 = vpop.permute.xlu1 %1178  ;;  %v3683_v60 = vmul.f32 %v1188_v30, %v4702_v43  ;;  %v1155_v23 = vsel %vm380_vm5, %v1143_v32, %v1151_v17 }
 0x3be   : > { %v3673_v31 = vmul.f32 %v1093_v9, %v2825_v18  ;;  %v3676_v1 = vmul.f32 %v1089_v45, %v2831_v20  ;;  %v1189_v24 = vsel %vm391_vm4, %v3664_v49, %v3513_v40  ;;  %v1159_v25 = vsel %vm380_vm5, %v1151_v17, %v1143_v32  ;;  %v4722_v32 = vld [vmem:[#allocation20_spill] sm:$0xff] }
 0x3bf   : > { %4720 = vst [vmem:[#allocation32_spill] sm:$0xff] %v3683_v60  ;;  %v3686_v7 = vmul.f32 %v1189_v24, %v4702_v43  ;;  %v1153_v24 = vsel %vm380_vm5, %v3503_v57, %v1147_v62  ;;  %v1157_v9 = vsel %vm380_vm5, %v1147_v62, %v3503_v57  ;;  %v1166_v17 = vmul.f32 %v1159_v25, %v2793_v52 }
 0x3c0   : > { %v1167_v60 = vmul.f32 %v1155_v23, %v4722_v32  ;;  %v1152_v57 = vsel %vm380_vm5, %v3515_v58, %v1145_v38  ;;  %v1156_v62 = vsel %vm380_vm5, %v1145_v38, %v3515_v58  ;;  %v1250_v38 = vsel %vm413_vm0, %v3553_v26, %v1245_v47 }
 0x3c1   : > { %4721 = vst [vmem:[#allocation33_spill] sm:$0xff] %v3686_v7  ;;  %v3750_v26 = vmul.f32 %v3634_v46, %v4698_v39 }
 0x3c4   : > { %v3698_v30 = vpop.permute.xlu0 %1212  ;;  %v3722_v54 = vpop.permute.xlu2 %1044 }
 0x3c5   : > { %v1149_v22 = vpop.permute.xlu1 %1148 }
 0x3c6   : > { %v1154_v45 = vsel %vm380_vm5, %v3523_v5, %v1149_v22  ;;  %v1158_v59 = vsel %vm380_vm5, %v1149_v22, %v3523_v5  ;;  %v1162_v22 = vmul.f32 %v1157_v9, %v2793_v52  ;;  %v1163_v5 = vmul.f32 %v1153_v24, %v4722_v32  ;;  %v4723_v9 = vld [vmem:[#allocation16_spill] sm:$0xff] }
 0x3c7   : > { %v1164_v7 = vmul.f32 %v1158_v59, %v2793_v52  ;;  %v1165_v43 = vmul.f32 %v1154_v45, %v4722_v32  ;;  %v1160_v59 = vmul.f32 %v1156_v62, %v2793_v52  ;;  %v1161_v45 = vmul.f32 %v1152_v57, %v4722_v32 }
 0x3c8   : > { %v1260_v24 = vmul.f32 %v1250_v38, %v4723_v9 }
 0x3c9   : > { %v1310_v25 = vpack.c.bf16 %v1166_v17, %v1164_v7  ;;  %v1311_v23 = vpack.c.bf16 %v1167_v60, %v1165_v43  ;;  %v1308_v13 = vpack.c.bf16 %v1162_v22, %v1160_v59  ;;  %v1309_v3 = vpack.c.bf16 %v1163_v5, %v1161_v45 }
 0x3ca   : > { %v1248_v60 = vsel %vm413_vm0, %v3485_v0, %v3611_v2  ;;  %v1249_v2 = vsel %vm413_vm0, %v3533_v61, %v3595_v4  ;;  %v1126_v22 = vsel %vm369_vm6, %v3638_v48, %v3565_v34  ;;  %v1121_v61 = vsel %vm369_vm6, %v3543_v42, %v3609_v44 }
 0x3cb   : > { %1396 = vmatpush.bf16.msra.mxu0 %v1310_v25  ;;  %1453 = vmatpush.bf16.msra.mxu3 %v1311_v23  ;;  %v1258_v62 = vmul.f32 %v1249_v2, %v4723_v9  ;;  %v1122_v4 = vsel %vm369_vm6, %v3565_v34, %v3638_v48  ;;  %v1218_v5 = vsel %vm402_vm1, %v3557_v55, %v3698_v30 }
 0x3cc   : > { %v1085_v27 = vpop.permute.xlu0 %1084  ;;  %v3730_v58 = vpop.permute.xlu2 %1182  ;;  %v1125_v25 = vsel %vm369_vm6, %v3609_v44, %v3543_v42  ;;  %v1124_v23 = vsel %vm369_vm6, %v3636_v63, %v3495_v11  ;;  %v1120_v48 = vsel %vm369_vm6, %v3495_v11, %v3636_v63 }
 0x3cd   : > { %v3728_v16 = vpop.permute.xlu1 %1180  ;;  %v1128_v11 = vmul.f32 %v1124_v23, %v2790_v51  ;;  %v1129_v63 = vmul.f32 %v1120_v48, %v2796_v53 }
 0x3cf   : > { %1397 = vmatpush.bf16.msra.mxu0 %v1308_v13  ;;  %1454 = vmatpush.bf16.msra.mxu3 %v1309_v3 }
 0x3d4   : > { %v1247_v43 = vpop.permute.xlu0 %1246  ;;  %v1055_v59 = vpop.permute.xlu2 %1054 }
 0x3d5   : > { %v1251_v7 = vsel %vm413_vm0, %v3583_v28, %v1247_v43  ;;  %v1255_v13 = vsel %vm413_vm0, %v1247_v43, %v3583_v28  ;;  %v3745_v3 = vpop.permute.xlu1 %1214  ;;  %v1256_v28 = vmul.f32 %v1248_v60, %v4723_v9  ;;  %v1132_v43 = vmul.f32 %v1126_v22, %v2790_v51 }
 0x3d6   : > { %v1262_v47 = vmul.f32 %v1251_v7, %v4723_v9  ;;  %v3754_v0 = vmul.f32 %v1255_v13, %v4698_v39  ;;  %v1219_v46 = vsel %vm402_vm1, %v3545_v56, %v3745_v3  ;;  %v1133_v7 = vmul.f32 %v1122_v4, %v2796_v53 }
 0x3d7   : > { %v1230_v45 = vmul.f32 %v1219_v46, %v2737_v14  ;;  %v1324_v34 = vpack.c.bf16 %v1258_v62, %v1256_v28  ;;  %v1228_v13 = vmul.f32 %v1218_v5, %v2737_v14  ;;  %v1130_v46 = vmul.f32 %v1125_v25, %v2790_v51 }
 0x3d8   : > { %v1326_v17 = vpack.c.bf16 %v1262_v47, %v1260_v24  ;;  %v1327_v57 = vpack.c.bf16 %v3754_v0, %v3750_v26  ;;  %v1187_v22 = vsel %vm391_vm4, %v3593_v41, %v3730_v58  ;;  %v1186_v4 = vsel %vm391_vm4, %v3535_v10, %v3728_v16  ;;  %v3918_v26 = vld [vmem:[#allocation2 + $0x10] ss:$0 sm:$0xff] }
 0x3d9   : > { %v1322_v28 = vpack.c.bf16 %v1230_v45, %v1228_v13  ;;  %v1090_v25 = vsel %vm358_vm8, %v3571_v33, %v1085_v27  ;;  %v1198_v48 = vmul.f32 %v1187_v22, %v2768_v35  ;;  %4733 = vst [vmem:[#allocation20_spill] sm:$0xff] %v3918_v26 }
 0x3da   : > { %1415 = vmatpush.bf16.msra.mxu1 %v1326_v17 }
 0x3dc   : > { %v1119_v38 = vpop.permute.xlu0 %1118 }
 0x3dd   : > { %v1123_v42 = vsel %vm369_vm6, %v3601_v29, %v1119_v38  ;;  %v1127_v44 = vsel %vm369_vm6, %v1119_v38, %v3601_v29  ;;  %v1087_v60 = vpop.permute.xlu1 %1086  ;;  %v1131_v29 = vmul.f32 %v1121_v61, %v2796_v53  ;;  %v1094_v61 = vsel %vm358_vm8, %v1085_v27, %v3571_v33  ;;  %v1049_v27 = vpop.permute.xlu2 %1048 }
 0x3de   : > { %v1134_v24 = vmul.f32 %v1127_v44, %v2790_v51  ;;  %v1135_v47 = vmul.f32 %v1123_v42, %v2796_v53  ;;  %1416 = vmatpush.bf16.msra.mxu1 %v1324_v34  ;;  %v1095_v62 = vsel %vm358_vm8, %v1087_v60, %v3555_v21  ;;  %v1091_v5 = vsel %vm358_vm8, %v3555_v21, %v1087_v60 }
 0x3df   : > { %v1102_v23 = vmul.f32 %v1095_v62, %v2825_v18  ;;  %v1304_v38 = vpack.c.bf16 %v1130_v46, %v1128_v11  ;;  %v1305_v34 = vpack.c.bf16 %v1131_v29, %v1129_v63  ;;  %v1185_v21 = vsel %vm391_vm4, %v3513_v40, %v3664_v49 }
 0x3e0   : > { %v1306_v2 = vpack.c.bf16 %v1134_v24, %v1132_v43  ;;  %v1307_v17 = vpack.c.bf16 %v1135_v47, %v1133_v7  ;;  %v1196_v43 = vmul.f32 %v1186_v4, %v2768_v35  ;;  %v1103_v42 = vmul.f32 %v1091_v5, %v2831_v20 }
 0x3e1   : > { %v1100_v60 = vmul.f32 %v1094_v61, %v2825_v18  ;;  %v1101_v33 = vmul.f32 %v1090_v25, %v2831_v20  ;;  %v4724_v7 = vpack.c.bf16 %v3651_v8, %v3645_v50  ;;  %v1184_v40 = vsel %vm391_vm4, %v3525_v37, %v3625_v15  ;;  %v4728_v61 = vld [vmem:[#allocation21_spill] sm:$0xff]  ;;  %v4729_v25 = vld [vmem:[#allocation23_spill] sm:$0xff] }
 0x3e2   : > { %1398 = vmatpush.bf16.msra.mxu0 %v1306_v2  ;;  %1417 = vmatpush.bf16.msra.mxu1 %v1322_v28  ;;  %v1194_v49 = vmul.f32 %v1185_v21, %v2768_v35  ;;  %v1318_v11 = vpack.c.bf16 %v1198_v48, %v1196_v43  ;;  %v1192_v37 = vmul.f32 %v1184_v40, %v2768_v35 }
 0x3e3   : > { %1455 = vmatpush.bf16.msra.mxu3 %v1307_v17  ;;  %v1302_v13 = vpack.c.bf16 %v1102_v23, %v1100_v60  ;;  %v1303_v63 = vpack.c.bf16 %v1103_v42, %v1101_v33  ;;  %v4725_v62 = vpack.c.bf16 %v3673_v31, %v3667_v36  ;;  %v1314_v23 = vpack.c.bf16 %v4729_v25, %v4728_v61  ;;  %v2199_v36 = vld [vmem:[%s4606_s4 + $0xc] sm:$0xf0]  ;;  %v4730_v42 = vld [vmem:[#allocation25_spill] sm:$0xff] }
 0x3e4   : > { %v1047_v45 = vpop.permute.xlu0 %1046 }
 0x3e5   : > { %v1053_v44 = vpop.permute.xlu1 %1052  ;;  %v1063_v24 = vsel %vm347_vm7, %v1055_v59, %v1047_v45  ;;  %v1059_v8 = vsel %vm347_vm7, %v1047_v45, %v1055_v59  ;;  %v1316_v59 = vpack.c.bf16 %v1194_v49, %v1192_v37  ;;  %v1271_v4 = vpop.permute.xlu2 %1270  ;;  %v2197_v49 = vld [vmem:[%s4606_s4] sm:$0xf]  ;;  %v1222_v37 = vsel %vm402_vm1, %v3698_v30, %v3557_v55 }
 0x3e6   : > { %1399 = vmatpush.bf16.msra.mxu0 %v1304_v38  ;;  %1418 = vmatpush.bf16.msra.mxu1 %v4724_v7  ;;  %v1062_v47 = vsel %vm347_vm7, %v1053_v44, %v3722_v54  ;;  %v1058_v50 = vsel %vm347_vm7, %v3722_v54, %v1053_v44  ;;  %v1070_v15 = vmul.f32 %v1063_v24, %v2821_v12  ;;  %v4726_v54 = vld [vmem:[#allocation31_spill] sm:$0xff] }
 0x3e7   : > { %1456 = vmatpush.bf16.msra.mxu3 %v1305_v34  ;;  %v1068_v2 = vmul.f32 %v1062_v47, %v2821_v12  ;;  %v1071_v17 = vmul.f32 %v1059_v8, %v2828_v19  ;;  %v1069_v46 = vmul.f32 %v1058_v50, %v2828_v19  ;;  %v4727_v22 = vpack.c.bf16 %v3676_v1, %v4726_v54  ;;  %v2268_v1 = vld [vmem:[%s4606_s4 + $0x4] sm:$0xf]  ;;  %v4731_v44 = vld [vmem:[#allocation27_spill] sm:$0xff]  ;;  %v4736_v54 = vld [vmem:[#allocation24_spill] sm:$0xff] }
 0x3e8   : > { %v1312_v60 = vpack.c.bf16 %v4731_v44, %v4730_v42  ;;  %v3899_v24 = vor.u32 %v2268_v1, %v2199_v36  ;;  %v1223_v8 = vsel %vm402_vm1, %v3745_v3, %v3545_v56 }
 0x3e9   : > { %v1298_v5 = vpack.c.bf16 %v1070_v15, %v1068_v2  ;;  %v1299_v45 = vpack.c.bf16 %v1071_v17, %v1069_v46  ;;  %v4732_v2 = vld [vmem:[#allocation17_spill] sm:$0xff] }
 0x3ea   : > { %1400 = vmatpush.bf16.msra.mxu0 %v1302_v13  ;;  %1419 = vmatpush.bf16.msra.mxu1 %v1318_v11  ;;  %v2269_v13 = vld [vmem:[%s4606_s4 + $0x8] sm:$0xf0] }
 0x3eb   : > { %1457 = vmatpush.bf16.msra.mxu3 %v1303_v63  ;;  %v2198_v63 = vor.u32 %v2269_v13, %v2197_v49  ;;  %v2270_v49 = vld [vmem:[%s4606_s4 + $0x10] sm:$0xf0]  ;;  %v4739_v13 = vld [vmem:[#allocation30_spill] sm:$0xff] }
 0x3ec   : > { %v1041_v28 = vpop.permute.xlu0 %1040 }
 0x3ed   : > { %v1043_v29 = vpop.permute.xlu1 %1042  ;;  %v1056_v38 = vsel %vm347_vm7, %v1041_v28, %v1049_v27  ;;  %v1060_v34 = vsel %vm347_vm7, %v1049_v27, %v1041_v28  ;;  %v1265_v50 = vpop.permute.xlu2 %1264  ;;  %v1231_v28 = vmul.f32 %v1223_v8, %v4732_v2 }
 0x3ee   : > { %1401 = vmatpush.bf16.msra.mxu0 %v4725_v62  ;;  %1420 = vmatpush.bf16.msra.mxu1 %v1316_v59  ;;  %v1064_v27 = vmul.f32 %v1060_v34, %v2821_v12  ;;  %v1065_v33 = vmul.f32 %v1056_v38, %v2828_v19  ;;  %v4735_v62 = vld [vmem:[#allocation22_spill] sm:$0xff] }
 0x3ef   : > { %1458 = vmatpush.bf16.msra.mxu3 %v4727_v22  ;;  %v4737_v22 = vpack.c.bf16 %v4735_v62, %v4736_v54  ;;  %v2217_v62 = vld [vmem:[%s4606_s4 + $0x20] sm:$0xf]  ;;  %v2273_v54 = vld [vmem:[%s4606_s4 + $0x28] sm:$0xf0] }
 0x3f2   : > { %1402 = vmatpush.bf16.msra.mxu0 %v1298_v5  ;;  %1421 = vmatpush.bf16.msra.mxu1 %v1314_v23  ;;  %v1229_v5 = vmul.f32 %v1222_v37, %v4732_v2  ;;  %v1191_v23 = vsel %vm391_vm4, %v3730_v58, %v3593_v41 }
 0x3f3   : > { %1459 = vmatpush.bf16.msra.mxu3 %v1299_v45 }
 0x3f4   : > { %v1051_v31 = vpop.permute.xlu0 %1050  ;;  %v1323_v45 = vpack.c.bf16 %v1231_v28, %v1229_v5 }
 0x3f5   : > { %v1057_v21 = vsel %vm347_vm7, %v1043_v29, %v1051_v31  ;;  %v1061_v48 = vsel %vm347_vm7, %v1051_v31, %v1043_v29  ;;  %v1269_v43 = vpop.permute.xlu1 %1268  ;;  %v1275_v38 = vpop.permute.xlu2 %1274  ;;  %v4738_v31 = vld [vmem:[#allocation19_spill] sm:$0xff] }
 0x3f6   : > { %v1066_v7 = vmul.f32 %v1061_v48, %v2821_v12  ;;  %v1067_v40 = vmul.f32 %v1057_v21, %v2828_v19  ;;  %1422 = vmatpush.bf16.msra.mxu1 %v1312_v60  ;;  %v1199_v1 = vmul.f32 %v1191_v23, %v4738_v31  ;;  %v2209_v60 = vld [vmem:[%s4606_s4 + $0x18] sm:$0xf] }
 0x3f8   : > { %v1296_v47 = vpack.c.bf16 %v1066_v7, %v1064_v27  ;;  %v1297_v11 = vpack.c.bf16 %v1067_v40, %v1065_v33  ;;  %v2272_v27 = vld [vmem:[%s4606_s4 + $0x20] sm:$0xf0]  ;;  %v2205_v40 = vld [vmem:[%s4606_s4 + $0x8] sm:$0xf] }
 0x3f9   : > { %1423 = vmatmul.bf16.vlgmr.msra.gmra.mxu1 %v3899_v24  ;;  %v2210_v37 = vor.u32 %v2272_v27, %v2209_v60  ;;  %v2206_v28 = vor.u32 %v2270_v49, %v2205_v40 }
 0x3fa   : > { %1403 = vmatpush.bf16.msra.mxu0 %v1296_v47  ;;  %1460 = vmatpush.bf16.msra.mxu3 %v1297_v11  ;;  %v4740_v47 = vld [vmem:[#allocation29_spill] sm:$0xff] }
 0x3fb   : > { %v4741_v11 = vpack.c.bf16 %v4739_v13, %v4740_v47 }
 0x3fc   : > { %v1277_v15 = vpop.permute.xlu0 %1276 }
 0x3fd   : > { %v1282_v56 = vsel %vm424_vm2, %v1269_v43, %v1277_v15  ;;  %v1286_v3 = vsel %vm424_vm2, %v1277_v15, %v1269_v43  ;;  %v1279_v17 = vpop.permute.xlu1 %1278  ;;  %1404 = vmatmul.bf16.vlgmr.msra.gmra.mxu0 %v2198_v63  ;;  %1461 = vmatmul.bf16.vlgmr.msra.gmra.mxu3 %v2198_v63 }
 0x3fe   : > { %1472 = vmatpush.bf16.msrb.mxu0 %v1327_v57  ;;  %v1292_v0 = vmul.f32 %v3918_v26, %v1282_v56  ;;  %v3921_v57 = vld [vmem:[#allocation2 + $0x18] ss:$0 sm:$0xff]  ;;  %v1283_v30 = vsel %vm424_vm2, %v1271_v4, %v1279_v17  ;;  %v1287_v46 = vsel %vm424_vm2, %v1279_v17, %v1271_v4  ;;  %v1190_v4 = vsel %vm391_vm4, %v3728_v16, %v3535_v10  ;;  %v2271_v16 = vld [vmem:[%s4606_s4 + $0x1c] sm:$0xf]  ;;  %v2211_v10 = vld [vmem:[%s4606_s4 + $0x24] sm:$0xf0] }
 0x3ff   : > { %4734 = vst [vmem:[#allocation16_spill] sm:$0xff] %v3921_v57  ;;  %v1293_v55 = vmul.f32 %v3921_v57, %v1286_v3  ;;  %v1294_v29 = vmul.f32 %v3918_v26, %v1283_v30  ;;  %v1295_v59 = vmul.f32 %v3921_v57, %v1287_v46  ;;  %v1197_v36 = vmul.f32 %v1190_v4, %v4738_v31  ;;  %v4742_v56 = vld [vmem:[#allocation33_spill] sm:$0xff]  ;;  %v4743_v3 = vld [vmem:[#allocation32_spill] sm:$0xff]  ;;  %v4747_v46 = vld [vmem:[#allocation14_spill] sm:$0xff] }
 0x400   : > { %v2214_v63 = vor.u32 %v2271_v16, %v2211_v10  ;;  %v4744_v17 = vpack.c.bf16 %v4742_v56, %v4743_v3 }
 0x401   : > { %v1330_v61 = vpack.c.bf16 %v1294_v29, %v1292_v0  ;;  %v1331_v25 = vpack.c.bf16 %v1295_v59, %v1293_v55  ;;  %v1319_v15 = vpack.c.bf16 %v1199_v1, %v1197_v36  ;;  %v4745_v0 = vld [vmem:[#allocation26_spill] sm:$0xff]  ;;  %v4746_v55 = vld [vmem:[#allocation28_spill] sm:$0xff]  ;;  %v4748_v29 = vld [vmem:[#allocation15_spill] sm:$0xff] }
 0x402   : > { %1473 = vmatpush.bf16.msrb.mxu0 %v4737_v22  ;;  %v1315_v30 = vpack.c.bf16 %v4746_v55, %v4745_v0  ;;  %v1313_v59 = vpack.c.bf16 %v4748_v29, %v4747_v46  ;;  %v2218_v22 = vor.u32 %v2273_v54, %v2217_v62 }
 0x403   : > { %1440 = vmatpush.bf16.msra.mxu2 %v1330_v61  ;;  %1497 = vmatpush.bf16.msrb.mxu1 %v1331_v25  ;;  %v1343_v61 = vpop.permute.xlu2 %1342 }
 0x404   : > { %v1267_v34 = vpop.permute.xlu0 %1266 }
 0x405   : > { %v1281_v21 = vsel %vm424_vm2, %v1267_v34, %v1275_v38  ;;  %v1285_v41 = vsel %vm424_vm2, %v1275_v38, %v1267_v34  ;;  %v1273_v58 = vpop.permute.xlu1 %1272 }
 0x406   : > { %1474 = vmatpush.bf16.msrb.mxu0 %v1323_v45  ;;  %v1290_v48 = vmul.f32 %v3918_v26, %v1281_v21  ;;  %v1291_v43 = vmul.f32 %v3921_v57, %v1285_v41  ;;  %v1280_v42 = vsel %vm424_vm2, %v1265_v50, %v1273_v58  ;;  %v1284_v44 = vsel %vm424_vm2, %v1273_v58, %v1265_v50 }
 0x407   : > { %v1288_v33 = vmul.f32 %v3918_v26, %v1280_v42  ;;  %v1289_v7 = vmul.f32 %v3921_v57, %v1284_v44 }
 0x409   : > { %v1328_v8 = vpack.c.bf16 %v1290_v48, %v1288_v33  ;;  %v1329_v50 = vpack.c.bf16 %v1291_v43, %v1289_v7  ;;  %1428 = vmatmul.bf16.gmra.mxu1 %v2214_v63 }
 0x40a   : > { %1475 = vmatpush.bf16.msrb.mxu0 %v4741_v11 }
 0x40b   : > { %1441 = vmatpush.bf16.msra.mxu2 %v1328_v8  ;;  %1498 = vmatpush.bf16.msrb.mxu1 %v1329_v50 }
 0x40c   : > { %v3995_v23 = vpop.permute.xlu0 %1352 }
 0x40d   : > { %1409 = vmatmul.bf16.gmra.mxu0 %v2210_v37  ;;  %1466 = vmatmul.bf16.gmra.mxu3 %v2210_v37  ;;  %v1358_v11 = vpop.permute.xlu1 %1357 }
 0x40e   : > { %1476 = vmatpush.bf16.msrb.mxu0 %v1319_v15  ;;  %2219 = vmatmul.msk.bf16.vlgmr.msra.gmra.mxu2 %vm898_vm10, %v2206_v28 }
 0x412   : > { %1477 = vmatpush.bf16.msrb.mxu0 %v4744_v17 }
 0x414   : > { %v1348_v41 = vpop.permute.xlu0 %1347 }
 0x416   : > { %1478 = vmatpush.bf16.msrb.mxu0 %v1315_v30 }
 0x419   : > { %2221 = vmatmul.msk.bf16.vlgmr.msrb.gmra.mxu1 %vm898_vm10, %v2206_v28 }
 0x41a   : > { %1479 = vmatpush.bf16.msrb.mxu0 %v1313_v59 }
 0x41d   : > { %1480 = vmatmul.bf16.vlgmr.msrb.gmra.mxu0 %v3899_v24 }
 0x41e   : > { %2220 = vmatmul.msk.bf16.gmra.mxu2 %vm898_vm10, %v2218_v22 }
 0x429   : > { %2222 = vmatmul.msk.bf16.gmra.mxu1 %vm898_vm10, %v2218_v22 }
 0x42d   : > { %1485 = vmatmul.bf16.gmra.mxu0 %v2214_v63 }
 0x476   : > { %v1424_v4 = vpop.f32.mrf.mxu1 }
 0x47a   : > { %v1405_v5 = vpop.f32.mrf.mxu0 }
 0x47b   : > { %v1406_v25 = vadd.f32 %v1405_v5, %v1343_v61 }
 0x47d   : > { %v1425_v45 = vadd.f32 %v1424_v4, %v1406_v25 }
 0x47e   : > { %v1426_v58 = vpop.f32.mrf.mxu1 }
 0x480   : > { %v1462_v56 = vpop.f32.mrf.mxu3 }
 0x481   : > { %v1463_v0 = vadd.f32 %v1462_v56, %v1343_v61 }
 0x482   : > { %v1407_v36 = vpop.f32.mrf.mxu0 }
 0x483   : > { %v1408_v24 = vadd.f32 %v1407_v36, %v1348_v41 }
 0x485   : > { %v1427_v10 = vadd.f32 %v1426_v58, %v1408_v24 }
 0x486   : > { %v1429_v27 = vpop.f32.mrf.mxu1 }
 0x488   : > { %v1464_v59 = vpop.f32.mrf.mxu3 }
 0x489   : > { %v1465_v22 = vadd.f32 %v1464_v59, %v1348_v41 }
 0x48a   : > { %v1410_v42 = vpop.f32.mrf.mxu0 }
 0x48b   : > { %v1411_v60 = vadd.f32 %v1410_v42, %v3995_v23 }
 0x48d   : > { %v1430_v7 = vadd.f32 %v1429_v27, %v1411_v60 }
 0x48e   : > { %v1431_v8 = vpop.f32.mrf.mxu1 }
 0x491   : > { %v1443_v38 = vpop.f32.mrf.mxu2 }
 0x492   : > { %v1444_v34 = vadd.f32 %v1443_v38, %v1425_v45  ;;  %v1412_v13 = vpop.f32.mrf.mxu0  ;;  %v1467_v45 = vpop.f32.mrf.mxu3 }
 0x493   : > { %v1413_v63 = vadd.f32 %v1412_v13, %v1358_v11 }
 0x494   : > { %v1510_v1 = vmul.f32 0.1, %v1444_v34 }
 0x495   : > { %v1432_v37 = vadd.f32 %v1431_v8, %v1413_v63 }
 0x496   : > { %v3997_v21 = vmax.f32 %v1444_v34, %v1510_v1  ;;  %v1500_v30 = vpop.f32.mrf.mxu1  ;;  %v1468_v1 = vadd.f32 %v1467_v45, %v3995_v23 }
 0x498   : > { %4749 = vst [vmem:[#allocation31_spill] sm:$0xff] %v3997_v21  ;;  %1691 = vrot.lane.b32.xlu2 %v3997_v21, %s2546_s16  ;;  %1723 = vrot.lane.b32.xlu1 %v3997_v21, %s2548_s19 }
 0x499   : > { %1627 = vrot.lane.b32.xlu0 %v3997_v21, %s2551_s29  ;;  %v1445_v16 = vpop.f32.mrf.mxu2 }
 0x49a   : > { %v1446_v48 = vadd.f32 %v1445_v16, %v1427_v10  ;;  %v1481_v17 = vpop.f32.mrf.mxu0  ;;  %v1469_v16 = vpop.f32.mrf.mxu3 }
 0x49b   : > { %v1482_v55 = vadd.f32 %v1481_v17, %v1463_v0 }
 0x49c   : > { %v1512_v43 = vmul.f32 0.1, %v1446_v48 }
 0x49d   : > { %v1501_v46 = vadd.f32 %v1500_v30, %v1482_v55 }
 0x49e   : > { %v4011_v44 = vmax.f32 %v1446_v48, %v1512_v43  ;;  %v1502_v61 = vpop.f32.mrf.mxu1  ;;  %v1470_v43 = vadd.f32 %v1469_v16, %v1358_v11 }
 0x49f   : > { %v1511_v29 = vmul.f32 0.1, %v1501_v46 }
 0x4a0   : > { %1563 = vrot.lane.b32.xlu2 %v3997_v21, %s2553_s9  ;;  %1595 = vrot.lane.b32.xlu1 %v3997_v21, %s2550_s23  ;;  %4750 = vst [vmem:[#allocation21_spill] sm:$0xff] %v4011_v44 }
 0x4a1   : > { %1659 = vrot.lane.b32.xlu0 %v3997_v21, %s2549_s22  ;;  %v1448_v33 = vpop.f32.mrf.mxu2  ;;  %v4054_v62 = vmax.f32 %v1501_v46, %v1511_v29 }
 0x4a2   : > { %v1449_v40 = vadd.f32 %v1448_v33, %v1430_v7  ;;  %v1483_v54 = vpop.f32.mrf.mxu0 }
 0x4a3   : > { %4751 = vst [vmem:[#allocation23_spill] sm:$0xff] %v4054_v62  ;;  %v1484_v5 = vadd.f32 %v1483_v54, %v1465_v22 }
 0x4a4   : > { %v1514_v49 = vmul.f32 0.1, %v1449_v40 }
 0x4a5   : > { %v1503_v25 = vadd.f32 %v1502_v61, %v1484_v5 }
 0x4a6   : > { %v4026_v47 = vmax.f32 %v1449_v40, %v1514_v49  ;;  %v1505_v41 = vpop.f32.mrf.mxu1 }
 0x4a7   : > { %v1513_v4 = vmul.f32 0.1, %v1503_v25 }
 0x4a8   : > { %1725 = vrot.lane.b32.xlu2 %v4011_v44, %s2548_s19  ;;  %1629 = vrot.lane.b32.xlu1 %v4011_v44, %s2551_s29 }
 0x4a9   : > { %1693 = vrot.lane.b32.xlu0 %v4011_v44, %s2546_s16  ;;  %v1450_v50 = vpop.f32.mrf.mxu2  ;;  %v4068_v38 = vmax.f32 %v1503_v25, %v1513_v4 }
 0x4aa   : > { %v1451_v15 = vadd.f32 %v1450_v50, %v1432_v37  ;;  %v1486_v34 = vpop.f32.mrf.mxu0 }
 0x4ab   : > { %4752 = vst [vmem:[#allocation25_spill] sm:$0xff] %v4068_v38  ;;  %v1487_v36 = vadd.f32 %v1486_v34, %v1468_v1 }
 0x4ac   : > { %v1516_v28 = vmul.f32 0.1, %v1451_v15 }
 0x4ad   : > { %v1506_v24 = vadd.f32 %v1505_v41, %v1487_v36  ;;  %v2223_v36 = vld [vmem:[%s4608_s6 + $0x60] sm:$0xff]  ;;  %v2224_v41 = vld [vmem:[%s4608_s6 + $0x68] sm:$0xff] }
 0x4ae   : > { %v4040_v3 = vmax.f32 %v1451_v15, %v1516_v28  ;;  %v1507_v27 = vpop.f32.mrf.mxu1 }
 0x4af   : > { %v1515_v23 = vmul.f32 0.1, %v1506_v24 }
 0x4b0   : > { %1597 = vrot.lane.b32.xlu2 %v4011_v44, %s2550_s23  ;;  %1661 = vrot.lane.b32.xlu1 %v4011_v44, %s2549_s22 }
 0x4b1   : > { %1565 = vrot.lane.b32.xlu0 %v4011_v44, %s2553_s9  ;;  %v4085_v10 = vmax.f32 %v1506_v24, %v1515_v23 }
 0x4b2   : > { %v1488_v48 = vpop.f32.mrf.mxu0 }
 0x4b3   : > { %4753 = vst [vmem:[#allocation27_spill] sm:$0xff] %v4085_v10  ;;  %v1489_v42 = vadd.f32 %v1488_v48, %v1470_v43  ;;  %v2226_v43 = vld [vmem:[%s4608_s6 + $0x78] sm:$0xff] }
 0x4b5   : > { %v1508_v33 = vadd.f32 %v1507_v27, %v1489_v42  ;;  %v2225_v42 = vld [vmem:[%s4608_s6 + $0x70] sm:$0xff] }
 0x4b7   : > { %v1517_v7 = vmul.f32 0.1, %v1508_v33 }
 0x4b8   : > { %1727 = vrot.lane.b32.xlu2 %v4026_v47, %s2548_s19  ;;  %1631 = vrot.lane.b32.xlu1 %v4026_v47, %s2551_s29 }
 0x4b9   : > { %1695 = vrot.lane.b32.xlu0 %v4026_v47, %s2546_s16  ;;  %v4103_v49 = vmax.f32 %v1508_v33, %v1517_v7 }
 0x4bb   : > { %4754 = vst [vmem:[#allocation17_spill] sm:$0xff] %v4103_v49 }
 0x4c0   : > { %1599 = vrot.lane.b32.xlu2 %v4026_v47, %s2550_s23  ;;  %1663 = vrot.lane.b32.xlu1 %v4026_v47, %s2549_s22 }
 0x4c1   : > { %1567 = vrot.lane.b32.xlu0 %v4026_v47, %s2553_s9 }
 0x4c8   : > { %1633 = vrot.lane.b32.xlu2 %v4040_v3, %s2551_s29  ;;  %1697 = vrot.lane.b32.xlu1 %v4040_v3, %s2546_s16 }
 0x4c9   : > { %1729 = vrot.lane.b32.xlu0 %v4040_v3, %s2548_s19 }
 0x4d0   : > { %1665 = vrot.lane.b32.xlu2 %v4040_v3, %s2549_s22  ;;  %1569 = vrot.lane.b32.xlu1 %v4040_v3, %s2553_s9 }
 0x4d1   : > { %1601 = vrot.lane.b32.xlu0 %v4040_v3, %s2550_s23 }
 0x4d8   : > { %1635 = vrot.lane.b32.xlu2 %v4054_v62, %s2551_s29  ;;  %1699 = vrot.lane.b32.xlu1 %v4054_v62, %s2546_s16 }
 0x4d9   : > { %1731 = vrot.lane.b32.xlu0 %v4054_v62, %s2548_s19 }
 0x4e0   : > { %1667 = vrot.lane.b32.xlu2 %v4054_v62, %s2549_s22  ;;  %1571 = vrot.lane.b32.xlu1 %v4054_v62, %s2553_s9 }
 0x4e1   : > { %1603 = vrot.lane.b32.xlu0 %v4054_v62, %s2550_s23 }
 0x4e8   : > { %1701 = vrot.lane.b32.xlu2 %v4068_v38, %s2546_s16  ;;  %1733 = vrot.lane.b32.xlu1 %v4068_v38, %s2548_s19 }
 0x4e9   : > { %1637 = vrot.lane.b32.xlu0 %v4068_v38, %s2551_s29 }
 0x4f0   : > { %1573 = vrot.lane.b32.xlu2 %v4068_v38, %s2553_s9  ;;  %1605 = vrot.lane.b32.xlu1 %v4068_v38, %s2550_s23 }
 0x4f1   : > { %1669 = vrot.lane.b32.xlu0 %v4068_v38, %s2549_s22 }
 0x4f2   : > { %v4083_v58 = vpop.permute.xlu2 %1691 }
 0x4f8   : > { %1703 = vrot.lane.b32.xlu2 %v4085_v10, %s2546_s16  ;;  %1735 = vrot.lane.b32.xlu1 %v4085_v10, %s2548_s19 }
 0x4f9   : > { %1639 = vrot.lane.b32.xlu0 %v4085_v10, %s2551_s29 }
 0x4fa   : > { %v4093_v60 = vpop.permute.xlu2 %1563 }
 0x500   : > { %1575 = vrot.lane.b32.xlu2 %v4085_v10, %s2553_s9  ;;  %1607 = vrot.lane.b32.xlu1 %v4085_v10, %s2550_s23 }
 0x501   : > { %1671 = vrot.lane.b32.xlu0 %v4085_v10, %s2549_s22 }
 0x502   : > { %v4101_v40 = vpop.permute.xlu2 %1725 }
 0x508   : > { %1737 = vrot.lane.b32.xlu2 %v4103_v49, %s2548_s19  ;;  %1641 = vrot.lane.b32.xlu1 %v4103_v49, %s2551_s29  ;;  %s2485_s29 = scalar_lea.hbm %s4609_s7, 128 }
 0x509   : > { %1705 = vrot.lane.b32.xlu0 %v4103_v49, %s2546_s16  ;;  %s2479_s16 = sshra.s32 %s2041_s15, 4  ;;  %s2480_s16 = int_to_ptr.hbm [resolvable:$true] %s2479_s16 }
 0x50a   : > { %v4111_v13 = vpop.permute.xlu2 %1597  ;;  %v4113_v11 = vpop.permute.xlu1 %1723  ;;  %s2481_s19 = scalar_lea.hbm %s2480_s16, 64  ;;  %p2486_p3 = scmp.lt.s32.totalorder %s2480_s16, %s4609_s7 }
 0x50b   : > { %v1628_v63 = vpop.permute.xlu0 %1627  ;;  %p2482_p0 = scmp.ne.s32.totalorder %s2480_s16, %s2481_s19  ;;  %p2487_p4 = scmp.lt.s32.totalorder %s2485_s29, %s2481_s19 }
 0x50d   : > { %p2483_p1 = pnand %p2482_p0, %p2635_p5  ;;  %p2488_p7 = por %p2487_p4, %p2486_p3 }
 0x50f   : > { %p2484_p2 = pneg %p2483_p1 }
 0x510   : > { %1609 = vrot.lane.b32.xlu2 %v4103_v49, %s2550_s23  ;;  %1535 = vrot.lane.b32.xlu1 %v4026_v47, %s2552_s8 }
 0x511   : > { %1577 = vrot.lane.b32.xlu0 %v4103_v49, %s2553_s9  ;;  %p2489_p8 = pnand %p2488_p7, %p2484_p2 }
 0x512   : > { %v4121_v8 = vpop.permute.xlu2 %1727  ;;  %v4123_v50 = vpop.permute.xlu1 %1595 }
 0x513   : > { %v1660_v37 = vpop.permute.xlu0 %1659 }
 0x518   : > { %1537 = vrot.lane.b32.xlu2 %v4040_v3, %s2552_s8  ;;  %1673 = vrot.lane.b32.xlu1 %v4103_v49, %s2549_s22 }
 0x519   : > { %1543 = vrot.lane.b32.xlu0 %v4085_v10, %s2552_s8 }
 0x51a   : > { %v4131_v15 = vpop.permute.xlu2 %1599  ;;  %v4133_v28 = vpop.permute.xlu1 %1629 }
 0x51b   : > { %v4135_v56 = vpop.permute.xlu0 %1693 }
 0x520   : > { %1531 = vrot.lane.b32.xlu2 %v3997_v21, %s2552_s8  ;;  %1545 = vrot.lane.b32.xlu1 %v4103_v49, %s2552_s8 }
 0x521   : > { %1533 = vrot.lane.b32.xlu0 %v4011_v44, %s2552_s8 }
 0x522   : > { %v4143_v17 = vpop.permute.xlu2 %1633  ;;  %v4145_v0 = vpop.permute.xlu1 %1661 }
 0x523   : > { %v4147_v55 = vpop.permute.xlu0 %1565 }
 0x528   : > { %1541 = vrot.lane.b32.xlu2 %v4068_v38, %s2552_s8  ;;  %1539 = vrot.lane.b32.xlu1 %v4054_v62, %s2552_s8 }
 0x529   : > { %1759 = vrot.lane.b32.xlu0 %v4026_v47, %s2547_s18 }
 0x52a   : > { %v4155_v30 = vpop.permute.xlu2 %1665  ;;  %v4157_v46 = vpop.permute.xlu1 %1631 }
 0x52b   : > { %v4159_v29 = vpop.permute.xlu0 %1695 }
 0x530   : > { %1767 = vrot.lane.b32.xlu2 %v4085_v10, %s2547_s18  ;;  %1761 = vrot.lane.b32.xlu1 %v4040_v3, %s2547_s18 }
 0x531   : > { %1769 = vrot.lane.b32.xlu0 %v4103_v49, %s2547_s18 }
 0x532   : > { %v1636_v59 = vpop.permute.xlu2 %1635  ;;  %v4167_v54 = vpop.permute.xlu1 %1663 }
 0x533   : > { %v1643_v22 = vsel %vm380_vm5, %v1628_v63, %v1636_v59  ;;  %v1647_v5 = vsel %vm380_vm5, %v1636_v59, %v1628_v63  ;;  %v4173_v61 = vpop.permute.xlu0 %1567 }
 0x534   : > { %v4257_v26 = vmul.f32 %v1643_v22, %v4722_v32 }
 0x538   : > { %1757 = vrot.lane.b32.xlu2 %v4011_v44, %s2547_s18  ;;  %1755 = vrot.lane.b32.xlu1 %v3997_v21, %s2547_s18 }
 0x539   : > { %1763 = vrot.lane.b32.xlu0 %v4054_v62, %s2547_s18 }
 0x53a   : > { %v1668_v25 = vpop.permute.xlu2 %1667  ;;  %v4181_v4 = vpop.permute.xlu1 %1697 }
 0x53b   : > { %v1675_v45 = vsel %vm391_vm4, %v1660_v37, %v1668_v25  ;;  %v1679_v34 = vsel %vm391_vm4, %v1668_v25, %v1660_v37  ;;  %v4187_v1 = vpop.permute.xlu0 %1729 }
 0x53c   : > { %v4280_v22 = vmul.f32 %v1675_v45, %v2768_v35 }
 0x540   : > { %1833 = vperm.xlu2 %2369, %v2223_v36   ;;  %1765 = vrot.lane.b32.xlu1 %v4068_v38, %s2547_s18  ;;  %s320_s18 = sand.u32 1, %s2527_s25  }
 0x541   : > { %1838 = vperm.xlu0 %2370, %v2224_v41   ;;  %s2144_s21 = sshll.u32 %s320_s18, 6  ;;  %s2026_s28 = scalar_lea.sflag [#allocation4], %s320_s18 }
 0x542   : > { %v4197_v24 = vpop.permute.xlu2 %1701  ;;  %v4199_v23 = vpop.permute.xlu1 %1569  ;;  %s4557_s2 = scalar_lea.vmem [#allocation8], %s2144_s21 }
 0x543   : > { %v1712_v16 = vsel %vm402_vm1, %v4197_v24, %v4135_v56  ;;  %v4205_v48 = vpop.permute.xlu0 %1601  ;;  %s2038_s14 = sshll.u32 %s4557_s2, 4  ;;  %s2039_s14 = int_to_ptr.vmem [resolvable:$true] %s2038_s14 }
 0x544   : > { %v4219_v37 = vmul.f32 %v1712_v16, %v4732_v2 }
 0x546   : > { %4755 = vst [vmem:[#allocation22_spill] sm:$0xff] %v4219_v37 }
 0x548   : > { %1848 = vperm.xlu2 %2369, %v2226_v43   ;;  %1843 = vperm.xlu1 %2368, %v2225_v42  }
 0x54a   : > { %v4213_v27 = vpop.permute.xlu2 %1573  ;;  %v1700_v33 = vpop.permute.xlu1 %1699 }
 0x54b   : > { %v1711_v7 = vsel %vm402_vm1, %v1700_v33, %v4083_v58  ;;  %v1732_v63 = vpop.permute.xlu0 %1731 }
 0x54c   : > { %v4222_v59 = vmul.f32 %v1711_v7, %v4732_v2  ;;  %v1743_v25 = vsel %vm413_vm0, %v1732_v63, %v4113_v11 }
 0x54d   : > { %v4240_v49 = vmul.f32 %v1743_v25, %v4698_v39 }
 0x54e   : > { %4756 = vst [vmem:[#allocation24_spill] sm:$0xff] %v4222_v59  ;;  %v4248_v59 = vmul.f32 %v1647_v5, %v2793_v52 }
 0x54f   : > { %4757 = vst [vmem:[#allocation30_spill] sm:$0xff] %v4240_v49 }
 0x552   : > { %v1704_v41 = vpop.permute.xlu2 %1703  ;;  %v4229_v43 = vpop.permute.xlu1 %1571 }
 0x553   : > { %v1713_v42 = vsel %vm402_vm1, %v1704_v41, %v4159_v29  ;;  %v4234_v38 = vpop.permute.xlu0 %1603 }
 0x55a   : > { %v1734_v16 = vpop.permute.xlu1 %1733  ;;  %v4242_v10 = vpop.permute.xlu2 %1575 }
 0x55b   : > { %v1744_v7 = vsel %vm413_vm0, %v1734_v16, %v4101_v40  ;;  %v1638_v62 = vpop.permute.xlu0 %1637 }
 0x55c   : > { %v4245_v36 = vmul.f32 %v1744_v7, %v4698_v39  ;;  %v1644_v37 = vsel %vm380_vm5, %v4133_v28, %v1638_v62  ;;  %v1648_v57 = vsel %vm380_vm5, %v1638_v62, %v4133_v28 }
 0x55d   : > { %v4260_v25 = vmul.f32 %v1648_v57, %v2793_v52  ;;  %v4263_v7 = vmul.f32 %v1644_v37, %v4722_v32  ;;  %v4283_v37 = vmul.f32 %v1679_v34, %v4738_v31 }
 0x55e   : > { %4758 = vst [vmem:[#allocation29_spill] sm:$0xff] %v4245_v36 }
 0x55f   : > { %4759 = vst [vmem:[#allocation33_spill] sm:$0xff] %v4283_v37  ;;  %v1739_v37 = vsel %vm413_vm0, %v4113_v11, %v1732_v63 }
 0x560   : > { %v1747_v36 = vmul.f32 %v1739_v37, %v4723_v9 }
 0x562   : > { %v4271_v39 = vpop.permute.xlu1 %1605  ;;  %v4285_v5 = vpop.permute.xlu2 %1737 }
 0x563   : > { %v1670_v62 = vpop.permute.xlu0 %1669  ;;  %4760 = vst [vmem:[#allocation32_spill] sm:$0xff] %v4285_v5  ;;  %v1742_v45 = vsel %vm413_vm0, %v4187_v1, %v4285_v5 }
 0x564   : > { %v1676_v57 = vsel %vm391_vm4, %v4145_v0, %v1670_v62  ;;  %v1680_v28 = vsel %vm391_vm4, %v1670_v62, %v4145_v0  ;;  %v1740_v62 = vsel %vm413_vm0, %v4101_v40, %v1734_v16  ;;  %v1753_v49 = vmul.f32 %v1742_v45, %v4723_v9 }
 0x565   : > { %v4288_v21 = vmul.f32 %v1676_v57, %v2768_v35  ;;  %v4291_v44 = vmul.f32 %v1680_v28, %v4738_v31  ;;  %v1707_v45 = vsel %vm402_vm1, %v4083_v58, %v1700_v33 }
 0x567   : > { %4761 = vst [vmem:[#allocation26_spill] sm:$0xff] %v4291_v44  ;;  %v1749_v44 = vmul.f32 %v1740_v62, %v4723_v9  ;;  %v4354_v62 = vmul.f32 %v1713_v42, %v4732_v2 }
 0x569   : > { %v1815_v16 = vpack.c.bf16 %v1749_v44, %v1747_v36  ;;  %v1709_v44 = vsel %vm402_vm1, %v4159_v29, %v1704_v41 }
 0x56a   : > { %v4301_v34 = vpop.permute.xlu1 %1735  ;;  %v1610_v11 = vpop.permute.xlu2 %1609 }
 0x56b   : > { %v1741_v57 = vsel %vm413_vm0, %v4121_v8, %v4301_v34  ;;  %v1640_v28 = vpop.permute.xlu0 %1639 }
 0x56c   : > { %v1751_v0 = vmul.f32 %v1741_v57, %v4723_v9  ;;  %v1645_v57 = vsel %vm380_vm5, %v4157_v46, %v1640_v28  ;;  %v1708_v9 = vsel %vm402_vm1, %v4135_v56, %v4197_v24 }
 0x56d   : > { %v1656_v63 = vmul.f32 %v1645_v57, %v4722_v32 }
 0x56e   : > { %v1817_v31 = vpack.c.bf16 %v1753_v49, %v1751_v0  ;;  %v1649_v49 = vsel %vm380_vm5, %v1640_v28, %v4157_v46  ;;  %v1719_v0 = vmul.f32 %v1709_v44, %v2737_v14 }
 0x56f   : > { %v1655_v33 = vmul.f32 %v1649_v49, %v2793_v52 }
 0x570   : > { %1906 = vmatpush.bf16.msrb.mxu3 %v1817_v31  ;;  %v1715_v31 = vmul.f32 %v1707_v45, %v2737_v14 }
 0x572   : > { %v1608_v40 = vpop.permute.xlu1 %1607 }
 0x573   : > { %v4317_v5 = vpop.permute.xlu0 %1671  ;;  %v1613_v45 = vsel %vm369_vm6, %v4131_v15, %v1608_v40 }
 0x574   : > { %1907 = vmatpush.bf16.msrb.mxu3 %v1815_v16  ;;  %v1624_v44 = vmul.f32 %v1613_v45, %v2796_v53 }
 0x57a   : > { %v1642_v58 = vpop.permute.xlu1 %1641 }
 0x57b   : > { %v1646_v46 = vsel %vm380_vm5, %v4143_v17, %v1642_v58  ;;  %v1650_v36 = vsel %vm380_vm5, %v1642_v58, %v4143_v17  ;;  %v1706_v56 = vpop.permute.xlu0 %1705 }
 0x57c   : > { %v1657_v24 = vmul.f32 %v1650_v36, %v2793_v52  ;;  %v1658_v37 = vmul.f32 %v1646_v46, %v4722_v32  ;;  %v1710_v29 = vsel %vm402_vm1, %v4181_v4, %v1706_v56  ;;  %v1714_v41 = vsel %vm402_vm1, %v1706_v56, %v4181_v4 }
 0x57d   : > { %v1721_v17 = vmul.f32 %v1710_v29, %v2737_v14  ;;  %v4358_v28 = vmul.f32 %v1714_v41, %v4732_v2  ;;  %v1717_v52 = vmul.f32 %v1708_v9, %v2737_v14  ;;  %v1617_v4 = vsel %vm369_vm6, %v1608_v40, %v4131_v15 }
 0x57e   : > { %v1801_v32 = vpack.c.bf16 %v1657_v24, %v1655_v33  ;;  %v1802_v16 = vpack.c.bf16 %v1658_v37, %v1656_v63  ;;  %v1618_v2 = vsel %vm369_vm6, %v1610_v11, %v4205_v48  ;;  %v1614_v14 = vsel %vm369_vm6, %v4205_v48, %v1610_v11 }
 0x57f   : > { %v1813_v57 = vpack.c.bf16 %v1721_v17, %v1719_v0  ;;  %v1814_v42 = vpack.c.bf16 %v4358_v28, %v4354_v62  ;;  %v1811_v49 = vpack.c.bf16 %v1717_v52, %v1715_v31  ;;  %v1581_v15 = vsel %vm358_vm8, %v4173_v61, %v4242_v10  ;;  %v1538_v31 = vpop.permute.xlu2 %1537 }
 0x580   : > { %1887 = vmatpush.bf16.msrb.mxu2 %v1801_v32  ;;  %1944 = vmatpush.bf16.msra.mxu1 %v1802_v16  ;;  %v1585_v40 = vsel %vm358_vm8, %v4242_v10, %v4173_v61  ;;  %v1623_v9 = vmul.f32 %v1617_v4, %v2790_v51  ;;  %v1615_v48 = vsel %vm369_vm6, %v4234_v38, %v4123_v50 }
 0x581   : > { %1908 = vmatpush.bf16.msrb.mxu3 %v1813_v57  ;;  %v1612_v11 = vsel %vm369_vm6, %v4111_v13, %v4271_v39  ;;  %v1616_v10 = vsel %vm369_vm6, %v4271_v39, %v4111_v13  ;;  %v1625_v61 = vmul.f32 %v1618_v2, %v2790_v51  ;;  %v1626_v63 = vmul.f32 %v1614_v14, %v2796_v53 }
 0x582   : > { %v1536_v58 = vpop.permute.xlu1 %1535  ;;  %v4762_v56 = vpack.c.bf16 %v4260_v25, %v4248_v59  ;;  %v4763_v39 = vpack.c.bf16 %v4263_v7, %v4257_v26  ;;  %v1591_v13 = vmul.f32 %v1585_v40, %v2825_v18  ;;  %v1592_v24 = vmul.f32 %v1581_v15, %v2831_v20 }
 0x583   : > { %v1578_v33 = vpop.permute.xlu0 %1577  ;;  %v1621_v59 = vmul.f32 %v1616_v10, %v2790_v51  ;;  %v1797_v25 = vpack.c.bf16 %v1625_v61, %v1623_v9  ;;  %v1798_v41 = vpack.c.bf16 %v1626_v63, %v1624_v44  ;;  %v1622_v26 = vmul.f32 %v1612_v11, %v2796_v53 }
 0x584   : > { %v1582_v46 = vsel %vm358_vm8, %v4199_v23, %v1578_v33  ;;  %v1586_v36 = vsel %vm358_vm8, %v1578_v33, %v4199_v23  ;;  %1888 = vmatpush.bf16.msrb.mxu2 %v4762_v56  ;;  %1945 = vmatpush.bf16.msra.mxu1 %v4763_v39  ;;  %v1611_v23 = vsel %vm369_vm6, %v4123_v50, %v4234_v38 }
 0x585   : > { %v1593_v37 = vmul.f32 %v1586_v36, %v2825_v18  ;;  %v1594_v29 = vmul.f32 %v1582_v46, %v2831_v20  ;;  %1909 = vmatpush.bf16.msrb.mxu3 %v1811_v49  ;;  %v1619_v17 = vmul.f32 %v1615_v48, %v2790_v51  ;;  %v1620_v52 = vmul.f32 %v1611_v23, %v2796_v53  ;;  %v4766_v23 = vld [vmem:[#allocation18_spill] sm:$0xff] }
 0x586   : > { %v1677_v32 = vsel %vm391_vm4, %v4167_v54, %v4317_v5  ;;  %v1583_v16 = vsel %vm358_vm8, %v4229_v43, %v4093_v60  ;;  %v1579_v4 = vsel %vm358_vm8, %v4093_v60, %v4229_v43  ;;  %v1584_v14 = vsel %vm358_vm8, %v4213_v27, %v4147_v55 }
 0x587   : > { %v1793_v7 = vpack.c.bf16 %v1593_v37, %v1591_v13  ;;  %v1794_v0 = vpack.c.bf16 %v1594_v29, %v1592_v24  ;;  %v1795_v50 = vpack.c.bf16 %v1621_v59, %v1619_v17  ;;  %v1796_v53 = vpack.c.bf16 %v1622_v26, %v1620_v52  ;;  %v1532_v49 = vpop.permute.xlu2 %1531  ;;  %v2231_v29 = vld [vmem:[#allocation7 + $0xc] sm:$0xf0]  ;;  %v4768_v26 = vld [vmem:[#allocation21_spill] sm:$0xff] }
 0x588   : > { %1889 = vmatpush.bf16.msrb.mxu2 %v1797_v25  ;;  %1946 = vmatpush.bf16.msra.mxu1 %v1798_v41  ;;  %v1687_v57 = vmul.f32 %v1677_v32, %v2768_v35  ;;  %v1580_v15 = vsel %vm358_vm8, %v4147_v55, %v4213_v27  ;;  %v1587_v40 = vmul.f32 %v1583_v16, %v2825_v18  ;;  %v4767_v41 = vld [vmem:[#allocation31_spill] sm:$0xff]  ;;  %v2229_v32 = vld [vmem:[#allocation7] sm:$0xf] }
 0x589   : > { %v1588_v43 = vmul.f32 %v1579_v4, %v2831_v20  ;;  %v1590_v9 = vmul.f32 %v1580_v15, %v2831_v20  ;;  %v1745_v13 = vsel %vm413_vm0, %v4301_v34, %v4121_v8 }
 0x58a   : > { %v4427_v38 = vpop.permute.xlu1 %1673  ;;  %v1752_v59 = vmul.f32 %v1745_v13, %v4766_v23  ;;  %v4775_v13 = vld [vmem:[#allocation22_spill] sm:$0xff] }
 0x58b   : > { %v1678_v51 = vsel %vm391_vm4, %v4155_v30, %v4427_v38  ;;  %v1544_v45 = vpop.permute.xlu0 %1543  ;;  %v1792_v61 = vpack.c.bf16 %v1590_v9, %v1588_v43 }
 0x58c   : > { %v1689_v2 = vmul.f32 %v1678_v51, %v2768_v35  ;;  %1890 = vmatpush.bf16.msrb.mxu2 %v1795_v50  ;;  %1947 = vmatpush.bf16.msra.mxu1 %v1796_v53  ;;  %v1589_v35 = vmul.f32 %v1584_v14, %v2825_v18  ;;  %v1549_v44 = vsel %vm347_vm7, %v1536_v58, %v1544_v45  ;;  %v2275_v50 = vld [vmem:[#allocation7 + $0x8] sm:$0xf0] }
 0x58d   : > { %v1553_v48 = vsel %vm347_vm7, %v1544_v45, %v1536_v58  ;;  %v1560_v20 = vmul.f32 %v1549_v44, %v2828_v19  ;;  %v4764_v58 = vpack.c.bf16 %v4288_v21, %v4280_v22  ;;  %v4765_v22 = vld [vmem:[#allocation32_spill] sm:$0xff] }
 0x58e   : > { %v1809_v60 = vpack.c.bf16 %v1689_v2, %v1687_v57  ;;  %v1791_v55 = vpack.c.bf16 %v1589_v35, %v1587_v40  ;;  %v1559_v33 = vmul.f32 %v1553_v48, %v2821_v12  ;;  %v1746_v37 = vsel %vm413_vm0, %v4765_v22, %v4187_v1  ;;  %v4770_v35 = vld [vmem:[#allocation16_spill] sm:$0xff] }
 0x58f   : > { %v1542_v39 = vpop.permute.xlu2 %1541  ;;  %v1754_v16 = vmul.f32 %v1746_v37, %v4766_v23  ;;  %v2230_v57 = vor.u32 %v2275_v50, %v2229_v32  ;;  %v4783_v32 = vld [vmem:[#allocation23_spill] sm:$0xff]  ;;  %v4784_v50 = vld [vmem:[#allocation25_spill] sm:$0xff] }
 0x590   : > { %1891 = vmatpush.bf16.msrb.mxu2 %v1793_v7  ;;  %1910 = vmatpush.bf16.msrb.mxu3 %v1809_v60  ;;  %v1803_v7 = vpack.c.bf16 %v4768_v26, %v4767_v41  ;;  %v4769_v60 = vld [vmem:[#allocation20_spill] sm:$0xff]  ;;  %v4779_v41 = vld [vmem:[#allocation33_spill] sm:$0xff] }
 0x591   : > { %1948 = vmatpush.bf16.msra.mxu1 %v1794_v0  ;;  %v1818_v4 = vpack.c.bf16 %v1754_v16, %v1752_v59  ;;  %v1804_v16 = vpack.c.bf16 %v4784_v50, %v4783_v32 }
 0x592   : > { %v1546_v11 = vpop.permute.xlu1 %1545 }
 0x593   : > { %v1550_v27 = vsel %vm347_vm7, %v1538_v31, %v1546_v11  ;;  %v1554_v10 = vsel %vm347_vm7, %v1546_v11, %v1538_v31  ;;  %v1534_v18 = vpop.permute.xlu0 %1533  ;;  %v1805_v31 = vpack.c.bf16 %v4040_v3, %v4026_v47  ;;  %v2274_v3 = vld [vmem:[#allocation7 + $0x4] sm:$0xf]  ;;  %v4771_v11 = vld [vmem:[#allocation29_spill] sm:$0xff] }
 0x594   : > { %v1561_v63 = vmul.f32 %v1554_v10, %v2821_v12  ;;  %v1562_v46 = vmul.f32 %v1550_v27, %v2828_v19  ;;  %1892 = vmatpush.bf16.msrb.mxu2 %v1791_v55  ;;  %1911 = vmatpush.bf16.msrb.mxu3 %v4764_v58  ;;  %v1548_v24 = vsel %vm347_vm7, %v1534_v18, %v1542_v39  ;;  %v4772_v55 = vld [vmem:[#allocation30_spill] sm:$0xff]  ;;  %v4774_v58 = vld [vmem:[#allocation19_spill] sm:$0xff] }
 0x595   : > { %1949 = vmatpush.bf16.msra.mxu1 %v1792_v61  ;;  %v1552_v21 = vsel %vm347_vm7, %v1542_v39, %v1534_v18  ;;  %v1558_v17 = vmul.f32 %v1548_v24, %v2828_v19  ;;  %v4496_v51 = vor.u32 %v2274_v3, %v2231_v29  ;;  %v4773_v27 = vpack.c.bf16 %v4771_v11, %v4772_v55  ;;  %v2278_v39 = vld [vmem:[#allocation7 + $0x20] sm:$0xf0] }
 0x596   : > { %v1789_v36 = vpack.c.bf16 %v1561_v63, %v1559_v33  ;;  %v1790_v56 = vpack.c.bf16 %v1562_v46, %v1560_v20  ;;  %v1557_v0 = vmul.f32 %v1552_v21, %v2821_v12  ;;  %v1682_v61 = vsel %vm391_vm4, %v4427_v38, %v4155_v30  ;;  %v2277_v20 = vld [vmem:[#allocation7 + $0x1c] sm:$0xf]  ;;  %v2243_v63 = vld [vmem:[#allocation7 + $0x24] sm:$0xf0]  ;;  %v4776_v24 = vld [vmem:[#allocation24_spill] sm:$0xff] }
 0x597   : > { %v1768_v2 = vpop.permute.xlu2 %1767  ;;  %v1681_v46 = vsel %vm391_vm4, %v4317_v5, %v4167_v54  ;;  %v4777_v62 = vpack.c.bf16 %v4775_v13, %v4776_v24 }
 0x598   : > { %1893 = vmatpush.bf16.msrb.mxu2 %v1789_v36  ;;  %1912 = vmatpush.bf16.msrb.mxu3 %v1805_v31  ;;  %v1690_v36 = vmul.f32 %v1682_v61, %v4774_v58  ;;  %v2246_v31 = vor.u32 %v2277_v20, %v2243_v63  ;;  %v1688_v30 = vmul.f32 %v1681_v46, %v4774_v58 }
 0x599   : > { %1950 = vmatpush.bf16.msra.mxu1 %v1790_v56  ;;  %v2241_v56 = vld [vmem:[#allocation7 + $0x18] sm:$0xf] }
 0x59a   : > { %v1540_v47 = vpop.permute.xlu1 %1539  ;;  %v2242_v28 = vor.u32 %v2278_v39, %v2241_v56 }
 0x59b   : > { %v1547_v8 = vsel %vm347_vm7, %v1532_v49, %v1540_v47  ;;  %v1551_v34 = vsel %vm347_vm7, %v1540_v47, %v1532_v49  ;;  %v1760_v25 = vpop.permute.xlu0 %1759 }
 0x59c   : > { %v1555_v1 = vmul.f32 %v1551_v34, %v2821_v12  ;;  %v1556_v52 = vmul.f32 %v1547_v8, %v2828_v19  ;;  %1913 = vmatpush.bf16.msrb.mxu3 %v1803_v7  ;;  %v1773_v12 = vsel %vm424_vm2, %v1760_v25, %v1768_v2  ;;  %v1777_v19 = vsel %vm424_vm2, %v1768_v2, %v1760_v25  ;;  %v2237_v8 = vld [vmem:[#allocation7 + $0x8] sm:$0xf]  ;;  %v2276_v34 = vld [vmem:[#allocation7 + $0x10] sm:$0xf0] }
 0x59d   : > { %v1783_v43 = vmul.f32 %v4769_v60, %v1773_v12  ;;  %v1784_v9 = vmul.f32 %v4770_v35, %v1777_v19  ;;  %v4778_v25 = vld [vmem:[#allocation26_spill] sm:$0xff]  ;;  %v2238_v6 = vor.u32 %v2276_v34, %v2237_v8 }
 0x59e   : > { %v1787_v45 = vpack.c.bf16 %v1557_v0, %v1555_v1  ;;  %v1788_v53 = vpack.c.bf16 %v1558_v17, %v1556_v52  ;;  %v4780_v26 = vpack.c.bf16 %v4778_v25, %v4779_v41  ;;  %v4781_v17 = vld [vmem:[#allocation27_spill] sm:$0xff]  ;;  %v4782_v1 = vld [vmem:[#allocation17_spill] sm:$0xff] }
 0x59f   : > { %1914 = vmatmul.bf16.vlgmr.msrb.gmra.mxu3 %v4496_v51  ;;  %v1758_v5 = vpop.permute.xlu2 %1757  ;;  %v1806_v52 = vpack.c.bf16 %v4782_v1, %v4781_v17 }
 0x5a0   : > { %1894 = vmatpush.bf16.msrb.mxu2 %v1787_v45  ;;  %1951 = vmatpush.bf16.msra.mxu1 %v1788_v53  ;;  %v2249_v45 = vld [vmem:[#allocation7 + $0x20] sm:$0xf]  ;;  %v2279_v53 = vld [vmem:[#allocation7 + $0x28] sm:$0xf0] }
 0x5a2   : > { %v1762_v14 = vpop.permute.xlu1 %1761 }
 0x5a3   : > { %v1770_v49 = vpop.permute.xlu0 %1769  ;;  %1895 = vmatmul.bf16.vlgmr.msrb.gmra.mxu2 %v2230_v57  ;;  %1952 = vmatmul.bf16.vlgmr.msra.gmra.mxu1 %v2230_v57 }
 0x5a4   : > { %1963 = vmatpush.bf16.msra.mxu2 %v1818_v4  ;;  %v1774_v15 = vsel %vm424_vm2, %v1762_v14, %v1770_v49  ;;  %v1778_v40 = vsel %vm424_vm2, %v1770_v49, %v1762_v14  ;;  %v2250_v4 = vor.u32 %v2279_v53, %v2249_v45 }
 0x5a5   : > { %v1785_v44 = vmul.f32 %v4769_v60, %v1774_v15  ;;  %v1786_v48 = vmul.f32 %v4770_v35, %v1778_v40 }
 0x5a7   : > { %v1821_v10 = vpack.c.bf16 %v1785_v44, %v1783_v43  ;;  %v1822_v18 = vpack.c.bf16 %v1786_v48, %v1784_v9  ;;  %v1834_v14 = vpop.permute.xlu2 %1833 }
 0x5a8   : > { %1964 = vmatpush.bf16.msra.mxu2 %v4773_v27 }
 0x5a9   : > { %1931 = vmatpush.bf16.msra.mxu0 %v1821_v10  ;;  %1988 = vmatpush.bf16.msra.mxu3 %v1822_v18 }
 0x5aa   : > { %v1756_v33 = vpop.permute.xlu1 %1755 }
 0x5ab   : > { %v1764_v38 = vpop.permute.xlu0 %1763 }
 0x5ac   : > { %1965 = vmatpush.bf16.msra.mxu2 %v1814_v42  ;;  %v1810_v42 = vpack.c.bf16 %v1690_v36, %v1688_v30  ;;  %v1771_v21 = vsel %vm424_vm2, %v1756_v33, %v1764_v38  ;;  %v1775_v54 = vsel %vm424_vm2, %v1764_v38, %v1756_v33 }
 0x5ad   : > { %v1779_v3 = vmul.f32 %v4769_v60, %v1771_v21  ;;  %v1780_v29 = vmul.f32 %v4770_v35, %v1775_v54 }
 0x5af   : > { %1919 = vmatmul.bf16.gmra.mxu3 %v2246_v31 }
 0x5b0   : > { %1966 = vmatpush.bf16.msra.mxu2 %v4777_v62  ;;  %v1849_v62 = vpop.permute.xlu2 %1848 }
 0x5b2   : > { %v1766_v22 = vpop.permute.xlu1 %1765 }
 0x5b3   : > { %v1772_v37 = vsel %vm424_vm2, %v1758_v5, %v1766_v22  ;;  %v1776_v47 = vsel %vm424_vm2, %v1766_v22, %v1758_v5  ;;  %1900 = vmatmul.bf16.gmra.mxu2 %v2242_v28  ;;  %1957 = vmatmul.bf16.gmra.mxu1 %v2242_v28 }
 0x5b4   : > { %1967 = vmatpush.bf16.msra.mxu2 %v1810_v42  ;;  %v1781_v23 = vmul.f32 %v4769_v60, %v1772_v37  ;;  %v1782_v59 = vmul.f32 %v4770_v35, %v1776_v47  ;;  %v1839_v35 = vpop.permute.xlu0 %1838 }
 0x5b6   : > { %v1819_v7 = vpack.c.bf16 %v1781_v23, %v1779_v3  ;;  %v1820_v0 = vpack.c.bf16 %v1782_v59, %v1780_v29 }
 0x5b8   : > { %1968 = vmatpush.bf16.msra.mxu2 %v4780_v26  ;;  %1932 = vmatpush.bf16.msra.mxu0 %v1819_v7 }
 0x5b9   : > { %1989 = vmatpush.bf16.msra.mxu3 %v1820_v0 }
 0x5ba   : > { %v1844_v33 = vpop.permute.xlu1 %1843 }
 0x5bb   : > { %2251 = vmatmul.msk.bf16.vlgmr.msra.gmra.mxu0 %vm898_vm10, %v2238_v6 }
 0x5bc   : > { %1969 = vmatpush.bf16.msra.mxu2 %v1806_v52 }
 0x5bf   : > { %2253 = vmatmul.msk.bf16.vlgmr.msra.gmra.mxu3 %vm898_vm10, %v2238_v6 }
 0x5c0   : > { %1970 = vmatpush.bf16.msra.mxu2 %v1804_v16 }
 0x5c3   : > { %1971 = vmatmul.bf16.vlgmr.msra.gmra.mxu2 %v4496_v51 }
 0x5cb   : > { %2252 = vmatmul.msk.bf16.gmra.mxu0 %vm898_vm10, %v2250_v4 }
 0x5cf   : > { %2254 = vmatmul.msk.bf16.gmra.mxu3 %vm898_vm10, %v2250_v4 }
 0x5d3   : > { %1976 = vmatmul.bf16.gmra.mxu2 %v2246_v31 }
 0x620   : > { %v1953_v48 = vpop.f32.mrf.mxu1 }
 0x621   : > { %v1954_v58 = vadd.f32 %v1953_v48, %v1834_v14 }
 0x622   : > { %v1915_v57 = vpop.f32.mrf.mxu3 }
 0x626   : > { %v1896_v2 = vpop.f32.mrf.mxu2 }
 0x627   : > { %v1897_v49 = vadd.f32 %v1896_v2, %v1834_v14 }
 0x628   : > { %v1955_v56 = vpop.f32.mrf.mxu1 }
 0x629   : > { %v1916_v60 = vadd.f32 %v1915_v57, %v1897_v49  ;;  %v1956_v5 = vadd.f32 %v1955_v56, %v1839_v35 }
 0x62a   : > { %v1917_v12 = vpop.f32.mrf.mxu3 }
 0x62e   : > { %v1898_v19 = vpop.f32.mrf.mxu2 }
 0x62f   : > { %v1899_v9 = vadd.f32 %v1898_v19, %v1839_v35 }
 0x630   : > { %v1958_v23 = vpop.f32.mrf.mxu1 }
 0x631   : > { %v1918_v10 = vadd.f32 %v1917_v12, %v1899_v9  ;;  %v1959_v26 = vadd.f32 %v1958_v23, %v1844_v33 }
 0x632   : > { %v1920_v15 = vpop.f32.mrf.mxu3 }
 0x636   : > { %v1901_v40 = vpop.f32.mrf.mxu2 }
 0x637   : > { %v1902_v20 = vadd.f32 %v1901_v40, %v1844_v33 }
 0x638   : > { %v1934_v51 = vpop.f32.mrf.mxu0  ;;  %v1960_v32 = vpop.f32.mrf.mxu1 }
 0x639   : > { %v1935_v43 = vadd.f32 %v1934_v51, %v1916_v60  ;;  %v1921_v31 = vadd.f32 %v1920_v15, %v1902_v20  ;;  %v1961_v16 = vadd.f32 %v1960_v32, %v1849_v62 }
 0x63a   : > { %v1922_v11 = vpop.f32.mrf.mxu3 }
 0x63b   : > { %v2001_v44 = vmul.f32 0.1, %v1935_v43 }
 0x63d   : > { %v2009_v55 = vmax.f32 %v1935_v43, %v2001_v44 }
 0x63e   : > { %v1903_v27 = vpop.f32.mrf.mxu2 }
 0x63f   : > { %2017 = vst [vmem:[%s4557_s2] sm:$0xff] %v2009_v55  ;;  %v1904_v28 = vadd.f32 %v1903_v27, %v1849_v62 }
 0x640   : > { %v1936_v18 = vpop.f32.mrf.mxu0 }
 0x641   : > { %v1937_v61 = vadd.f32 %v1936_v18, %v1918_v10  ;;  %v1923_v3 = vadd.f32 %v1922_v11, %v1904_v28 }
 0x642   : > { %v1991_v46 = vpop.f32.mrf.mxu3 }
 0x643   : > { %v2003_v63 = vmul.f32 0.1, %v1937_v61 }
 0x645   : > { %v2011_v36 = vmax.f32 %v1937_v61, %v2003_v63 }
 0x646   : > { %v1972_v39 = vpop.f32.mrf.mxu2 }
 0x647   : > { %2019 = vst [vmem:[%s4557_s2 + $0x10] sm:$0xff] %v2011_v36  ;;  %v1973_v30 = vadd.f32 %v1972_v39, %v1954_v58 }
 0x648   : > { %v1939_v38 = vpop.f32.mrf.mxu0 }
 0x649   : > { %v1940_v13 = vadd.f32 %v1939_v38, %v1921_v31  ;;  %v1992_v24 = vadd.f32 %v1991_v46, %v1973_v30 }
 0x64a   : > { %v1993_v54 = vpop.f32.mrf.mxu3 }
 0x64b   : > { %v2005_v42 = vmul.f32 0.1, %v1940_v13  ;;  %v2002_v21 = vmul.f32 0.1, %v1992_v24 }
 0x64d   : > { %v2013_v22 = vmax.f32 %v1940_v13, %v2005_v42  ;;  %v2010_v37 = vmax.f32 %v1992_v24, %v2002_v21 }
 0x64e   : > { %v1974_v47 = vpop.f32.mrf.mxu2 }
 0x64f   : > { %2021 = vst [vmem:[%s4557_s2 + $0x20] sm:$0xff] %v2013_v22  ;;  %v1975_v29 = vadd.f32 %v1974_v47, %v1956_v5 }
 0x650   : > { %2018 = vst [vmem:[%s4557_s2 + $0x8] sm:$0xff] %v2010_v37  ;;  %v1941_v59 = vpop.f32.mrf.mxu0 }
 0x651   : > { %v1942_v8 = vadd.f32 %v1941_v59, %v1923_v3  ;;  %v1994_v34 = vadd.f32 %v1993_v54, %v1975_v29 }
 0x652   : > { %v1996_v17 = vpop.f32.mrf.mxu3 }
 0x653   : > { %v2007_v25 = vmul.f32 0.1, %v1942_v8  ;;  %v2004_v41 = vmul.f32 0.1, %v1994_v34 }
 0x655   : > { %v2015_v7 = vmax.f32 %v1942_v8, %v2007_v25  ;;  %v2012_v0 = vmax.f32 %v1994_v34, %v2004_v41 }
 0x656   : > { %v1977_v6 = vpop.f32.mrf.mxu2 }
 0x657   : > { %2023 = vst [vmem:[%s4557_s2 + $0x30] sm:$0xff] %v2015_v7  ;;  %v1978_v1 = vadd.f32 %v1977_v6, %v1959_v26 }
 0x658   : > { %2020 = vst [vmem:[%s4557_s2 + $0x18] sm:$0xff] %v2012_v0 }
 0x659   : > { %v1997_v52 = vadd.f32 %v1996_v17, %v1978_v1 }
 0x65a   : > { %v1998_v57 = vpop.f32.mrf.mxu3 }
 0x65b   : > { %v2006_v50 = vmul.f32 0.1, %v1997_v52 }
 0x65d   : > { %v2014_v45 = vmax.f32 %v1997_v52, %v2006_v50 }
 0x65e   : > { %v1979_v53 = vpop.f32.mrf.mxu2 }
 0x65f   : > { %2022 = vst [vmem:[%s4557_s2 + $0x28] sm:$0xff] %v2014_v45  ;;  %v1980_v4 = vadd.f32 %v1979_v53, %v1961_v16 }
 0x661   : > { %v1999_v2 = vadd.f32 %v1998_v57, %v1980_v4 }
 0x663   : > { %v2008_v12 = vmul.f32 0.1, %v1999_v2 }
 0x665   : > { %v2016_v19 = vmax.f32 %v1999_v2, %v2008_v12 }
 0x667   : > { %2024 = vst [vmem:[%s4557_s2 + $0x38] sm:$0xff] %v2016_v19 }
 0x668   : > { %2492 = shalt.err (!%p2489_p8)
}
 0x669   : > { %s2555_s20 = smov 256   ;;  %s2556_s18 = smov 512  }
 0x66a   : > { %2293 = dma.vmem_to_hbm [thread:$0]  (%p2635_p5), %s2039_s14, 1024, %s2041_s15, %s2026_s28, %s2555_s20, %s2556_s18, %s2553_s9  }
 0x66b PF: > { %p2315_p9 = scmp.ge.s32.totalorder %s2535_s27, 2  ;;  %s2055_s21 = sand.u32 1, %s2523_s24  }
 0x66c   : > { %s2056_s2 = scalar_lea.sflag [#allocation4], %s2055_s21 }
 0x66d   : > { %p2306_p10 = pnand %p2315_p9, %p2639_p6 }
 0x66f   : > { %p2307_p11 = pneg %p2306_p10 }
 0x671   : > { %2518 = dma.done.wait (%p2307_p11), %s2056_s2, 1024  }
 0x672   : > { %2520 = vsyncadd (%p2307_p11), %s2056_s2, 4294966272  ;;  %s4785_s1 = sld [smem:[#allocation12_spill]]  ;;  %p19_p12 = scmp.ge.s32.totalorder %s2622_s30, 4  }
 0x673   : > { %s4786_s26 = sld [smem:[#allocation13_spill]]  ;;  %s4787_s24 = smov %s2527_s25 }
 0x674   : > { %s4789_s27 = smov %s2622_s30  ;;  %21 = sbr.rel (!%p19_p12) target bundleno = 8 (0x8), region = 99 }
 0x678   : > { %s4788_s25 = smov %s4785_s1 }
 0x679   :  { %2062 = vsyncpa [#allocation3], 1 }
 0x67a   :  { %2064 = vsyncpa [#allocation3 + $0x1], 1 }
 0x67b   :  { %2065 = vsyncpa [#allocation6], 1 }
 0x67c   :  { %2066 = vsyncpa [#allocation4], 1 }
 0x67d   :  { %2068 = vsyncpa [#allocation4 + $0x1], 1 }

</bundles_post_ra>
